<compile_context>
chip_gen: v5e
topology: v5e:2x2
jax: 0.10.0
libtpu: 0.0.40
codegen_flags: <defaults>
</compile_context>

<pallas_src>
import math

import jax
import jax.numpy as jnp
from jax.experimental import pallas as pl
from jax.experimental.pallas import tpu as pltpu

# ----------------------------- model hyper-parameters (small, synthetic) ---------------
B = 2            # batch
P = 8            # max peaks per spectrum (seq length)
F = 16           # formula feature dim (input per-peak features)
H = 32           # hidden_size
NHEAD = 4        # attention heads
DH = H // NHEAD  # head dim
FF = 64          # FFN inner dim
L = 2            # number of transformer encoder layers
MAGMA = 128      # magma_modulo  (fragment fingerprint size)
OUT = 256        # output_size   (spectra fingerprint size)
LN_EPS = 1e-5

PARAM_ORDER = [
    "w_emb", "b_emb",
    "wqkv", "bqkv", "wo", "bo",
    "g1", "be1", "w1", "b1", "w2", "b2", "g2", "be2",
    "fw", "fb", "sw", "sb",
]


def _layernorm(v, g, b):
    mu = jnp.mean(v, axis=-1, keepdims=True)
    var = jnp.mean((v - mu) ** 2, axis=-1, keepdims=True)
    return (v - mu) * jax.lax.rsqrt(var + LN_EPS) * g + b


def spectra_encoder_kernel(
    x_ref, mask_ref,
    w_emb_ref, b_emb_ref,
    wqkv_ref, bqkv_ref, wo_ref, bo_ref,
    g1_ref, be1_ref, w1_ref, b1_ref, w2_ref, b2_ref, g2_ref, be2_ref,
    fw_ref, fb_ref, sw_ref, sb_ref,
    frag_ref, peak0_ref,
):
    bt, p, f = x_ref.shape
    m = bt * p            # all peaks of this batch tile, stacked on sublanes

    x = x_ref[...].reshape(m, f)                    # (M, F)
    mask = mask_ref[...]                            # (BT, 1, P) 1.0 = valid, 0.0 = pad
    key_bias = (1.0 - mask) * (-1e9)                # additive key-padding bias (hoisted)

    # ---- formula embedder ("float") -----------------------------------------------------
    h = jnp.dot(x.astype(jnp.bfloat16), w_emb_ref[...],
                preferred_element_type=jnp.float32) + b_emb_ref[...]          # (M, H) f32

    # ---- transformer encoder stack (post-LN, like nn.TransformerEncoderLayer) -----------
    for l in range(L):
        # fused QKV: one wide bf16 matmul; 1/sqrt(DH) pre-folded into the Q columns.
        qkv = jnp.dot(h.astype(jnp.bfloat16), wqkv_ref[l],
                      preferred_element_type=jnp.float32) + bqkv_ref[l]       # (M, 3H)

        # per-head attention (P=DH=8: tiny matmuls either way); exact softmax reciprocal.
        o_heads = []
        for n in range(NHEAD):
            lo = n * DH
            qh = qkv[:, lo:lo + DH].reshape(bt, p, DH)
            kh = qkv[:, H + lo:H + lo + DH].reshape(bt, p, DH)
            vh = qkv[:, 2 * H + lo:2 * H + lo + DH].reshape(bt, p, DH)
            s = jnp.einsum("bqd,bkd->bqk", qh, kh,
                           preferred_element_type=jnp.float32) + key_bias     # (BT, P, P)
            s = s - jnp.max(s, axis=-1, keepdims=True)
            pr = jnp.exp(s)
            pr = pr / jnp.sum(pr, axis=-1, keepdims=True)
            o_heads.append(jnp.einsum("bqk,bkd->bqd", pr, vh,
                                      preferred_element_type=jnp.float32))    # (BT, P, DH)

        # concat heads on the lane axis -> (M, H), then one K=H output projection.
        attn_in = jnp.concatenate(o_heads, axis=-1).reshape(m, H)
        attn = jnp.dot(attn_in.astype(jnp.bfloat16), wo_ref[l],
                       preferred_element_type=jnp.float32) + bo_ref[l]        # (M, H)

        h = _layernorm(h + attn, g1_ref[l], be1_ref[l])

        ffn = jnp.maximum(
            jnp.dot(h.astype(jnp.bfloat16), w1_ref[l],
                    preferred_element_type=jnp.float32) + b1_ref[l], 0.0)
        ffn = jnp.dot(ffn.astype(jnp.bfloat16), w2_ref[l],
                      preferred_element_type=jnp.float32) + b2_ref[l]

        h = _layernorm(h + ffn, g2_ref[l], be2_ref[l])

    # ---- fragment head on all peak rows --------------------------------------------------
    frag = jnp.dot(h.astype(jnp.bfloat16), fw_ref[...],
                   preferred_element_type=jnp.float32) + fb_ref[...]          # (M, MAGMA)
    frag_ref[...] = frag.reshape(bt, p, MAGMA)

    # ---- spectra head + h0 on the peak-0 rows only ---------------------------------------
    h0 = h.reshape(bt, p, H)[:, 0, :]                                         # (BT, H)
    z0 = jnp.dot(h0.astype(jnp.bfloat16), sw_ref[...],
                 preferred_element_type=jnp.float32) + sb_ref[...]            # (BT, OUT)
    out0 = jax.nn.sigmoid(z0)
    # single lane-dense peak-0 slab: [sigmoid(spectra-head) | h0]
    peak0_ref[...] = jnp.concatenate([out0, h0], axis=-1).reshape(bt, 1, OUT + H)


def _weight_spec(arr):
    nd = arr.ndim
    return pl.BlockSpec(arr.shape, lambda b, _nd=nd: (0,) * _nd)


def prepare_params(params):
    """Re-layout PyTorch-style params for the kernel (done once, outside the kernel).

    Matmul weights are stored in bf16 (MXU-native on v6e/v7x, halves VMEM/HBM bytes);
    biases and LayerNorm params stay f32 and are added to the f32 accumulators.
    """
    inv = 1.0 / math.sqrt(DH)
    bf = lambda a: a.astype(jnp.bfloat16)

    wqkv = jnp.concatenate([params["wq"] * inv, params["wk"], params["wv"]], axis=-1)
    bqkv = jnp.concatenate([params["bq"] * inv, params["bk"], params["bv"]], axis=-1)

    return {
        "w_emb": bf(params["w_emb"]),
        "b_emb": params["b_emb"].reshape(1, H),
        "wqkv": bf(wqkv),                                   # (L, H, 3H)
        "bqkv": bqkv.reshape(L, 1, 3 * H),
        "wo": bf(params["wo"]),                             # (L, H, H) un-split (concat order)
        "bo": params["bo"].reshape(L, 1, H),
        "g1": params["g1"].reshape(L, 1, H),
        "be1": params["be1"].reshape(L, 1, H),
        "w1": bf(params["w1"]),
        "b1": params["b1"].reshape(L, 1, FF),
        "w2": bf(params["w2"]),
        "b2": params["b2"].reshape(L, 1, H),
        "g2": params["g2"].reshape(L, 1, H),
        "be2": params["be2"].reshape(L, 1, H),
        "fw": bf(params["fw"]),                             # fragment head (H, MAGMA)
        "fb": params["fb"].reshape(1, MAGMA),
        "sw": bf(params["sw"]),                             # spectra head (H, OUT), peak-0 only
        "sb": params["sb"].reshape(1, OUT),
    }


def spectra_encoder_forward(x, mask, params, *, b_tile=None):
    """x: (B, P, F) float32; mask: (B, 1, P) float32 (1 = valid peak)."""
    Bv, Pv, Fv = x.shape
    if b_tile is None:
        # Target ~256 sublane rows per grid step (v6e/v7x MXU; pass b_tile ~ 128//P for
        # v5e), then cap so the parallel grid has >=2 steps so v7x's 2nd TensorCore works.
        b_tile = min(Bv, max(1, 256 // Pv))
        if Bv >= 2:
            b_tile = min(b_tile, max(1, Bv // 2))
    assert Bv % b_tile == 0, "batch must be divisible by b_tile"

    prepped = prepare_params(params)
    flat = [prepped[name] for name in PARAM_ORDER]

    grid = (Bv // b_tile,)
    in_specs = [
        pl.BlockSpec((b_tile, Pv, Fv), lambda b: (b, 0, 0)),
        pl.BlockSpec((b_tile, 1, Pv), lambda b: (b, 0, 0)),
    ] + [_weight_spec(pp) for pp in flat]

    out_shape = (
        jax.ShapeDtypeStruct((Bv, Pv, MAGMA), jnp.float32),
        jax.ShapeDtypeStruct((Bv, 1, OUT + H), jnp.float32),   # lane-dense [sigmoid | h0]
    )
    out_specs = (
        pl.BlockSpec((b_tile, Pv, MAGMA), lambda b: (b, 0, 0)),
        pl.BlockSpec((b_tile, 1, OUT + H), lambda b: (b, 0, 0)),
    )

    fn = pl.pallas_call(
        spectra_encoder_kernel,
        grid=grid,
        in_specs=in_specs,
        out_specs=out_specs,
        out_shape=out_shape,
        compiler_params=pltpu.CompilerParams(dimension_semantics=("parallel",)),
    )
    frag, peak0 = fn(x, mask, *flat)
    output = peak0[:, 0, :OUT]                  # (B, OUT) sigmoid spectra fingerprint
    aux_outputs = {
        "pred_frag_fps": frag,                  # (B, P, MAGMA)
        "h0": peak0[:, 0, OUT:],                # (B, H) encoder_output
    }
    return output, aux_outputs


def init_params(key):
    ks = iter(jax.random.split(key, 32))

    def lin(k, fan_in, shape):
        return jax.random.normal(k, shape, jnp.float32) / math.sqrt(fan_in)

    params = {
        "w_emb": lin(next(ks), F, (F, H)),
        "b_emb": jnp.zeros((H,), jnp.float32),
        # transformer stack (stacked over layers)
        "wq": lin(next(ks), H, (L, H, H)),
        "bq": jnp.zeros((L, H), jnp.float32),
        "wk": lin(next(ks), H, (L, H, H)),
        "bk": jnp.zeros((L, H), jnp.float32),
        "wv": lin(next(ks), H, (L, H, H)),
        "bv": jnp.zeros((L, H), jnp.float32),
        "wo": lin(next(ks), H, (L, H, H)),
        "bo": jnp.zeros((L, H), jnp.float32),
        "g1": jnp.ones((L, H), jnp.float32),
        "be1": jnp.zeros((L, H), jnp.float32),
        "w1": lin(next(ks), H, (L, H, FF)),
        "b1": jnp.zeros((L, FF), jnp.float32),
        "w2": lin(next(ks), FF, (L, FF, H)),
        "b2": jnp.zeros((L, H), jnp.float32),
        "g2": jnp.ones((L, H), jnp.float32),
        "be2": jnp.zeros((L, H), jnp.float32),
        # heads
        "fw": lin(next(ks), H, (H, MAGMA)),
        "fb": jnp.zeros((MAGMA,), jnp.float32),
        "sw": lin(next(ks), H, (H, OUT)),
        "sb": jnp.zeros((OUT,), jnp.float32),
    }
    return params


def reference_forward(x, mask, params):
    """Pure-JAX f32 reference mirroring the original per-head / per-spectrum formulation."""
    inv = 1.0 / math.sqrt(DH)
    outs, frags, h0s = [], [], []
    for b in range(x.shape[0]):
        xb, mb = x[b], mask[b]                       # (P, F), (1, P)
        bias = (1.0 - mb) * (-1e9)
        h = xb @ params["w_emb"] + params["b_emb"]
        for l in range(L):
            q = h @ params["wq"][l] + params["bq"][l]
            k = h @ params["wk"][l] + params["bk"][l]
            v = h @ params["wv"][l] + params["bv"][l]
            heads = []
            for n in range(NHEAD):
                lo, hi = n * DH, (n + 1) * DH
                s = (q[:, lo:hi] @ k[:, lo:hi].T) * inv + bias
                heads.append(jax.nn.softmax(s, axis=-1) @ v[:, lo:hi])
            attn = jnp.concatenate(heads, -1) @ params["wo"][l] + params["bo"][l]
            h = _layernorm(h + attn, params["g1"][l], params["be1"][l])
            ffn = jax.nn.relu(h @ params["w1"][l] + params["b1"][l])
            ffn = ffn @ params["w2"][l] + params["b2"][l]
            h = _layernorm(h + ffn, params["g2"][l], params["be2"][l])
        frags.append(h @ params["fw"] + params["fb"])
        h0s.append(h[0])
        outs.append(jax.nn.sigmoid(h[0] @ params["sw"] + params["sb"]))
    return jnp.stack(outs), jnp.stack(frags), jnp.stack(h0s)


if __name__ == "__main__":
    key = jax.random.PRNGKey(0)
    k_param, k_x = jax.random.split(key)

    params = init_params(k_param)

    # synthetic "batch": per-peak formula features + number of valid peaks per spectrum
    x = jax.random.normal(k_x, (B, P, F), jnp.float32)
    num_peaks = jnp.array([P, 5], jnp.int32)
    mask = (jnp.arange(P)[None, :] < num_peaks[:, None]).astype(jnp.float32)[:, None, :]  # (B,1,P)

    output, aux = spectra_encoder_forward(x, mask, params)
    output = jax.block_until_ready(output)
    frag = jax.block_until_ready(aux["pred_frag_fps"])
    h0 = jax.block_until_ready(aux["h0"])

    assert output.shape == (B, OUT)
    assert frag.shape == (B, P, MAGMA)
    assert h0.shape == (B, H)
    assert bool(jnp.all(jnp.isfinite(output)))
    assert bool(jnp.all((output >= 0.0) & (output <= 1.0)))   # sigmoid head

    # correctness vs pure-JAX f32 reference; softmax is exact, drift comes only from
    # bf16 matmul operands (f32 accumulation) -> ~1e-2 worst case at these shapes.
    ref_out, ref_frag, ref_h0 = reference_forward(x, mask, params)
    tol = 5e-2
    assert bool(jnp.max(jnp.abs(output - ref_out)) < tol)
    assert bool(jnp.max(jnp.abs(frag - ref_frag)) < tol)
    assert bool(jnp.max(jnp.abs(h0 - ref_h0)) < tol)

    print("KERNEL_OK")
</pallas_src>

<mosaic_0001>
module attributes {stable_mosaic.version = 11 : i64} {
  func.func @spectra_encoder_kernel(%arg0: i32, %arg1: memref<1x8x16xf32, #tpu.memory_space<vmem>>, %arg2: memref<1x1x8xf32, #tpu.memory_space<vmem>>, %arg3: memref<16x32xbf16, #tpu.memory_space<vmem>>, %arg4: memref<1x32xf32, #tpu.memory_space<vmem>>, %arg5: memref<2x32x96xbf16, #tpu.memory_space<vmem>>, %arg6: memref<2x1x96xf32, #tpu.memory_space<vmem>>, %arg7: memref<2x32x32xbf16, #tpu.memory_space<vmem>>, %arg8: memref<2x1x32xf32, #tpu.memory_space<vmem>>, %arg9: memref<2x1x32xf32, #tpu.memory_space<vmem>>, %arg10: memref<2x1x32xf32, #tpu.memory_space<vmem>>, %arg11: memref<2x32x64xbf16, #tpu.memory_space<vmem>>, %arg12: memref<2x1x64xf32, #tpu.memory_space<vmem>>, %arg13: memref<2x64x32xbf16, #tpu.memory_space<vmem>>, %arg14: memref<2x1x32xf32, #tpu.memory_space<vmem>>, %arg15: memref<2x1x32xf32, #tpu.memory_space<vmem>>, %arg16: memref<2x1x32xf32, #tpu.memory_space<vmem>>, %arg17: memref<32x128xbf16, #tpu.memory_space<vmem>>, %arg18: memref<1x128xf32, #tpu.memory_space<vmem>>, %arg19: memref<32x256xbf16, #tpu.memory_space<vmem>>, %arg20: memref<1x256xf32, #tpu.memory_space<vmem>>, %arg21: memref<1x8x128xf32, #tpu.memory_space<vmem>>, %arg22: memref<1x1x288xf32, #tpu.memory_space<vmem>>) attributes {dimension_semantics = [#tpu.dimension_semantics<parallel>], iteration_bounds = array<i64: 2>, scalar_prefetch = 0 : i64, scratch_operands = 0 : i64, tpu.core_type = #tpu.core_type<tc>, window_params = [{transform_indices = @transform_0, window_bounds = array<i64: 1, 8, 16>}, {transform_indices = @transform_1, window_bounds = array<i64: 1, 1, 8>}, {pipeline_mode = #tpu.pipeline_mode<synchronous>, transform_indices = @transform_2, window_bounds = array<i64: 16, 32>}, {pipeline_mode = #tpu.pipeline_mode<synchronous>, transform_indices = @transform_3, window_bounds = array<i64: 1, 32>}, {pipeline_mode = #tpu.pipeline_mode<synchronous>, transform_indices = @transform_4, window_bounds = array<i64: 2, 32, 96>}, {pipeline_mode = #tpu.pipeline_mode<synchronous>, transform_indices = @transform_5, window_bounds = array<i64: 2, 1, 96>}, {pipeline_mode = #tpu.pipeline_mode<synchronous>, transform_indices = @transform_6, window_bounds = array<i64: 2, 32, 32>}, {pipeline_mode = #tpu.pipeline_mode<synchronous>, transform_indices = @transform_7, window_bounds = array<i64: 2, 1, 32>}, {pipeline_mode = #tpu.pipeline_mode<synchronous>, transform_indices = @transform_8, window_bounds = array<i64: 2, 1, 32>}, {pipeline_mode = #tpu.pipeline_mode<synchronous>, transform_indices = @transform_9, window_bounds = array<i64: 2, 1, 32>}, {pipeline_mode = #tpu.pipeline_mode<synchronous>, transform_indices = @transform_10, window_bounds = array<i64: 2, 32, 64>}, {pipeline_mode = #tpu.pipeline_mode<synchronous>, transform_indices = @transform_11, window_bounds = array<i64: 2, 1, 64>}, {pipeline_mode = #tpu.pipeline_mode<synchronous>, transform_indices = @transform_12, window_bounds = array<i64: 2, 64, 32>}, {pipeline_mode = #tpu.pipeline_mode<synchronous>, transform_indices = @transform_13, window_bounds = array<i64: 2, 1, 32>}, {pipeline_mode = #tpu.pipeline_mode<synchronous>, transform_indices = @transform_14, window_bounds = array<i64: 2, 1, 32>}, {pipeline_mode = #tpu.pipeline_mode<synchronous>, transform_indices = @transform_15, window_bounds = array<i64: 2, 1, 32>}, {pipeline_mode = #tpu.pipeline_mode<synchronous>, transform_indices = @transform_16, window_bounds = array<i64: 32, 128>}, {pipeline_mode = #tpu.pipeline_mode<synchronous>, transform_indices = @transform_17, window_bounds = array<i64: 1, 128>}, {pipeline_mode = #tpu.pipeline_mode<synchronous>, transform_indices = @transform_18, window_bounds = array<i64: 32, 256>}, {pipeline_mode = #tpu.pipeline_mode<synchronous>, transform_indices = @transform_19, window_bounds = array<i64: 1, 256>}, {transform_indices = @transform_20, window_bounds = array<i64: 1, 8, 128>}, {transform_indices = @transform_21, window_bounds = array<i64: 1, 1, 288>}]} {
    %c0 = arith.constant 0 : index
    %c0_0 = arith.constant 0 : index
    %c0_1 = arith.constant 0 : index
    %0 = vector.load %arg1[%c0, %c0_0, %c0_1] : memref<1x8x16xf32, #tpu.memory_space<vmem>>, vector<1x8x16xf32>
    %1 = vector.shape_cast %0 : vector<1x8x16xf32> to vector<8x16xf32>
    %c0_2 = arith.constant 0 : index
    %c0_3 = arith.constant 0 : index
    %c0_4 = arith.constant 0 : index
    %2 = vector.load %arg2[%c0_2, %c0_3, %c0_4] : memref<1x1x8xf32, #tpu.memory_space<vmem>>, vector<1x1x8xf32>
    %cst = arith.constant 1.000000e+00 : f32
    %3 = vector.broadcast %cst : f32 to vector<1x1x8xf32>
    %4 = arith.subf %3, %2 : vector<1x1x8xf32>
    %cst_5 = arith.constant -1.000000e+09 : f32
    %5 = vector.broadcast %cst_5 : f32 to vector<1x1x8xf32>
    %6 = arith.mulf %4, %5 : vector<1x1x8xf32>
    %7 = arith.truncf %1 : vector<8x16xf32> to vector<8x16xbf16>
    %c0_6 = arith.constant 0 : index
    %c0_7 = arith.constant 0 : index
    %8 = vector.load %arg3[%c0_6, %c0_7] : memref<16x32xbf16, #tpu.memory_space<vmem>>, vector<16x32xbf16>
    %cst_8 = arith.constant dense<0.000000e+00> : vector<8x32xf32>
    %9 = tpu.matmul %7, %8, %cst_8 {dimension_numbers = #tpu.dot_dimension_numbers<[1], [0], [0], [1], [0, 0, 1, 1], [], []>} : vector<8x16xbf16>, vector<16x32xbf16>, vector<8x32xf32> -> vector<8x32xf32>
    %c0_9 = arith.constant 0 : index
    %c0_10 = arith.constant 0 : index
    %10 = vector.load %arg4[%c0_9, %c0_10] : memref<1x32xf32, #tpu.memory_space<vmem>>, vector<1x32xf32>
    %11 = vector.broadcast %10 : vector<1x32xf32> to vector<8x32xf32>
    %12 = arith.addf %9, %11 : vector<8x32xf32>
    %13 = arith.truncf %12 : vector<8x32xf32> to vector<8x32xbf16>
    %c0_11 = arith.constant 0 : index
    %c0_12 = arith.constant 0 : index
    %c0_13 = arith.constant 0 : index
    %14 = vector.load %arg5[%c0_11, %c0_12, %c0_13] : memref<2x32x96xbf16, #tpu.memory_space<vmem>>, vector<1x32x96xbf16>
    %15 = vector.shape_cast %14 : vector<1x32x96xbf16> to vector<32x96xbf16>
    %cst_14 = arith.constant dense<0.000000e+00> : vector<8x96xf32>
    %16 = tpu.matmul %13, %15, %cst_14 {dimension_numbers = #tpu.dot_dimension_numbers<[1], [0], [0], [1], [0, 0, 1, 1], [], []>} : vector<8x32xbf16>, vector<32x96xbf16>, vector<8x96xf32> -> vector<8x96xf32>
    %c0_15 = arith.constant 0 : index
    %c0_16 = arith.constant 0 : index
    %c0_17 = arith.constant 0 : index
    %17 = vector.load %arg6[%c0_15, %c0_16, %c0_17] : memref<2x1x96xf32, #tpu.memory_space<vmem>>, vector<1x1x96xf32>
    %18 = vector.shape_cast %17 : vector<1x1x96xf32> to vector<1x96xf32>
    %19 = vector.broadcast %18 : vector<1x96xf32> to vector<8x96xf32>
    %20 = arith.addf %16, %19 : vector<8x96xf32>
    %21 = vector.extract_strided_slice %20 {offsets = [0, 0], sizes = [8, 8], strides = [1, 1]} : vector<8x96xf32> to vector<8x8xf32>
    %22 = vector.shape_cast %21 : vector<8x8xf32> to vector<1x8x8xf32>
    %23 = vector.extract_strided_slice %20 {offsets = [0, 32], sizes = [8, 8], strides = [1, 1]} : vector<8x96xf32> to vector<8x8xf32>
    %24 = vector.shape_cast %23 : vector<8x8xf32> to vector<1x8x8xf32>
    %25 = vector.extract_strided_slice %20 {offsets = [0, 64], sizes = [8, 8], strides = [1, 1]} : vector<8x96xf32> to vector<8x8xf32>
    %26 = vector.shape_cast %25 : vector<8x8xf32> to vector<1x8x8xf32>
    "tpu.trace_start"() <{level = 10 : i32, message = "bqd,bkd->bqk"}> : () -> ()
    %cst_18 = arith.constant dense<0.000000e+00> : vector<1x8x8xf32>
    %27 = tpu.matmul %22, %24, %cst_18 {dimension_numbers = #tpu.dot_dimension_numbers<[2], [2], [1], [1], [0, 0, 0, 1, 1, 1], [0], [0]>} : vector<1x8x8xf32>, vector<1x8x8xf32>, vector<1x8x8xf32> -> vector<1x8x8xf32>
    "tpu.trace_stop"() : () -> ()
    %28 = vector.broadcast %6 : vector<1x1x8xf32> to vector<1x8x8xf32>
    %29 = arith.addf %27, %28 : vector<1x8x8xf32>
    %cst_19 = arith.constant dense<0xFF800000> : vector<1x8xf32>
    %30 = vector.multi_reduction <maximumf>, %29, %cst_19 [2] : vector<1x8x8xf32> to vector<1x8xf32>
    %31 = vector.shape_cast %30 : vector<1x8xf32> to vector<1x8x1xf32>
    %32 = vector.broadcast %31 : vector<1x8x1xf32> to vector<1x8x8xf32>
    %33 = arith.subf %29, %32 : vector<1x8x8xf32>
    %34 = math.exp %33 : vector<1x8x8xf32>
    %cst_20 = arith.constant dense<0.000000e+00> : vector<1x8xf32>
    %35 = vector.multi_reduction <add>, %34, %cst_20 [2] : vector<1x8x8xf32> to vector<1x8xf32>
    %36 = vector.shape_cast %35 : vector<1x8xf32> to vector<1x8x1xf32>
    %37 = vector.broadcast %36 : vector<1x8x1xf32> to vector<1x8x8xf32>
    %38 = arith.divf %34, %37 : vector<1x8x8xf32>
    "tpu.trace_start"() <{level = 10 : i32, message = "bqk,bkd->bqd"}> : () -> ()
    %cst_21 = arith.constant dense<0.000000e+00> : vector<1x8x8xf32>
    %39 = tpu.matmul %38, %26, %cst_21 {dimension_numbers = #tpu.dot_dimension_numbers<[2], [1], [1], [2], [0, 0, 0, 1, 1, 2], [0], [0]>} : vector<1x8x8xf32>, vector<1x8x8xf32>, vector<1x8x8xf32> -> vector<1x8x8xf32>
    "tpu.trace_stop"() : () -> ()
    %40 = vector.extract_strided_slice %20 {offsets = [0, 8], sizes = [8, 8], strides = [1, 1]} : vector<8x96xf32> to vector<8x8xf32>
    %41 = vector.shape_cast %40 : vector<8x8xf32> to vector<1x8x8xf32>
    %42 = vector.extract_strided_slice %20 {offsets = [0, 40], sizes = [8, 8], strides = [1, 1]} : vector<8x96xf32> to vector<8x8xf32>
    %43 = vector.shape_cast %42 : vector<8x8xf32> to vector<1x8x8xf32>
    %44 = vector.extract_strided_slice %20 {offsets = [0, 72], sizes = [8, 8], strides = [1, 1]} : vector<8x96xf32> to vector<8x8xf32>
    %45 = vector.shape_cast %44 : vector<8x8xf32> to vector<1x8x8xf32>
    "tpu.trace_start"() <{level = 10 : i32, message = "bqd,bkd->bqk"}> : () -> ()
    %cst_22 = arith.constant dense<0.000000e+00> : vector<1x8x8xf32>
    %46 = tpu.matmul %41, %43, %cst_22 {dimension_numbers = #tpu.dot_dimension_numbers<[2], [2], [1], [1], [0, 0, 0, 1, 1, 1], [0], [0]>} : vector<1x8x8xf32>, vector<1x8x8xf32>, vector<1x8x8xf32> -> vector<1x8x8xf32>
    "tpu.trace_stop"() : () -> ()
    %47 = vector.broadcast %6 : vector<1x1x8xf32> to vector<1x8x8xf32>
    %48 = arith.addf %46, %47 : vector<1x8x8xf32>
    %cst_23 = arith.constant dense<0xFF800000> : vector<1x8xf32>
    %49 = vector.multi_reduction <maximumf>, %48, %cst_23 [2] : vector<1x8x8xf32> to vector<1x8xf32>
    %50 = vector.shape_cast %49 : vector<1x8xf32> to vector<1x8x1xf32>
    %51 = vector.broadcast %50 : vector<1x8x1xf32> to vector<1x8x8xf32>
    %52 = arith.subf %48, %51 : vector<1x8x8xf32>
    %53 = math.exp %52 : vector<1x8x8xf32>
    %cst_24 = arith.constant dense<0.000000e+00> : vector<1x8xf32>
    %54 = vector.multi_reduction <add>, %53, %cst_24 [2] : vector<1x8x8xf32> to vector<1x8xf32>
    %55 = vector.shape_cast %54 : vector<1x8xf32> to vector<1x8x1xf32>
    %56 = vector.broadcast %55 : vector<1x8x1xf32> to vector<1x8x8xf32>
    %57 = arith.divf %53, %56 : vector<1x8x8xf32>
    "tpu.trace_start"() <{level = 10 : i32, message = "bqk,bkd->bqd"}> : () -> ()
    %cst_25 = arith.constant dense<0.000000e+00> : vector<1x8x8xf32>
    %58 = tpu.matmul %57, %45, %cst_25 {dimension_numbers = #tpu.dot_dimension_numbers<[2], [1], [1], [2], [0, 0, 0, 1, 1, 2], [0], [0]>} : vector<1x8x8xf32>, vector<1x8x8xf32>, vector<1x8x8xf32> -> vector<1x8x8xf32>
    "tpu.trace_stop"() : () -> ()
    %59 = vector.extract_strided_slice %20 {offsets = [0, 16], sizes = [8, 8], strides = [1, 1]} : vector<8x96xf32> to vector<8x8xf32>
    %60 = vector.shape_cast %59 : vector<8x8xf32> to vector<1x8x8xf32>
    %61 = vector.extract_strided_slice %20 {offsets = [0, 48], sizes = [8, 8], strides = [1, 1]} : vector<8x96xf32> to vector<8x8xf32>
    %62 = vector.shape_cast %61 : vector<8x8xf32> to vector<1x8x8xf32>
    %63 = vector.extract_strided_slice %20 {offsets = [0, 80], sizes = [8, 8], strides = [1, 1]} : vector<8x96xf32> to vector<8x8xf32>
    %64 = vector.shape_cast %63 : vector<8x8xf32> to vector<1x8x8xf32>
    "tpu.trace_start"() <{level = 10 : i32, message = "bqd,bkd->bqk"}> : () -> ()
    %cst_26 = arith.constant dense<0.000000e+00> : vector<1x8x8xf32>
    %65 = tpu.matmul %60, %62, %cst_26 {dimension_numbers = #tpu.dot_dimension_numbers<[2], [2], [1], [1], [0, 0, 0, 1, 1, 1], [0], [0]>} : vector<1x8x8xf32>, vector<1x8x8xf32>, vector<1x8x8xf32> -> vector<1x8x8xf32>
    "tpu.trace_stop"() : () -> ()
    %66 = vector.broadcast %6 : vector<1x1x8xf32> to vector<1x8x8xf32>
    %67 = arith.addf %65, %66 : vector<1x8x8xf32>
    %cst_27 = arith.constant dense<0xFF800000> : vector<1x8xf32>
    %68 = vector.multi_reduction <maximumf>, %67, %cst_27 [2] : vector<1x8x8xf32> to vector<1x8xf32>
    %69 = vector.shape_cast %68 : vector<1x8xf32> to vector<1x8x1xf32>
    %70 = vector.broadcast %69 : vector<1x8x1xf32> to vector<1x8x8xf32>
    %71 = arith.subf %67, %70 : vector<1x8x8xf32>
    %72 = math.exp %71 : vector<1x8x8xf32>
    %cst_28 = arith.constant dense<0.000000e+00> : vector<1x8xf32>
    %73 = vector.multi_reduction <add>, %72, %cst_28 [2] : vector<1x8x8xf32> to vector<1x8xf32>
    %74 = vector.shape_cast %73 : vector<1x8xf32> to vector<1x8x1xf32>
    %75 = vector.broadcast %74 : vector<1x8x1xf32> to vector<1x8x8xf32>
    %76 = arith.divf %72, %75 : vector<1x8x8xf32>
    "tpu.trace_start"() <{level = 10 : i32, message = "bqk,bkd->bqd"}> : () -> ()
    %cst_29 = arith.constant dense<0.000000e+00> : vector<1x8x8xf32>
    %77 = tpu.matmul %76, %64, %cst_29 {dimension_numbers = #tpu.dot_dimension_numbers<[2], [1], [1], [2], [0, 0, 0, 1, 1, 2], [0], [0]>} : vector<1x8x8xf32>, vector<1x8x8xf32>, vector<1x8x8xf32> -> vector<1x8x8xf32>
    "tpu.trace_stop"() : () -> ()
    %78 = vector.extract_strided_slice %20 {offsets = [0, 24], sizes = [8, 8], strides = [1, 1]} : vector<8x96xf32> to vector<8x8xf32>
    %79 = vector.shape_cast %78 : vector<8x8xf32> to vector<1x8x8xf32>
    %80 = vector.extract_strided_slice %20 {offsets = [0, 56], sizes = [8, 8], strides = [1, 1]} : vector<8x96xf32> to vector<8x8xf32>
    %81 = vector.shape_cast %80 : vector<8x8xf32> to vector<1x8x8xf32>
    %82 = vector.extract_strided_slice %20 {offsets = [0, 88], sizes = [8, 8], strides = [1, 1]} : vector<8x96xf32> to vector<8x8xf32>
    %83 = vector.shape_cast %82 : vector<8x8xf32> to vector<1x8x8xf32>
    "tpu.trace_start"() <{level = 10 : i32, message = "bqd,bkd->bqk"}> : () -> ()
    %cst_30 = arith.constant dense<0.000000e+00> : vector<1x8x8xf32>
    %84 = tpu.matmul %79, %81, %cst_30 {dimension_numbers = #tpu.dot_dimension_numbers<[2], [2], [1], [1], [0, 0, 0, 1, 1, 1], [0], [0]>} : vector<1x8x8xf32>, vector<1x8x8xf32>, vector<1x8x8xf32> -> vector<1x8x8xf32>
    "tpu.trace_stop"() : () -> ()
    %85 = vector.broadcast %6 : vector<1x1x8xf32> to vector<1x8x8xf32>
    %86 = arith.addf %84, %85 : vector<1x8x8xf32>
    %cst_31 = arith.constant dense<0xFF800000> : vector<1x8xf32>
    %87 = vector.multi_reduction <maximumf>, %86, %cst_31 [2] : vector<1x8x8xf32> to vector<1x8xf32>
    %88 = vector.shape_cast %87 : vector<1x8xf32> to vector<1x8x1xf32>
    %89 = vector.broadcast %88 : vector<1x8x1xf32> to vector<1x8x8xf32>
    %90 = arith.subf %86, %89 : vector<1x8x8xf32>
    %91 = math.exp %90 : vector<1x8x8xf32>
    %cst_32 = arith.constant dense<0.000000e+00> : vector<1x8xf32>
    %92 = vector.multi_reduction <add>, %91, %cst_32 [2] : vector<1x8x8xf32> to vector<1x8xf32>
    %93 = vector.shape_cast %92 : vector<1x8xf32> to vector<1x8x1xf32>
    %94 = vector.broadcast %93 : vector<1x8x1xf32> to vector<1x8x8xf32>
    %95 = arith.divf %91, %94 : vector<1x8x8xf32>
    "tpu.trace_start"() <{level = 10 : i32, message = "bqk,bkd->bqd"}> : () -> ()
    %cst_33 = arith.constant dense<0.000000e+00> : vector<1x8x8xf32>
    %96 = tpu.matmul %95, %83, %cst_33 {dimension_numbers = #tpu.dot_dimension_numbers<[2], [1], [1], [2], [0, 0, 0, 1, 1, 2], [0], [0]>} : vector<1x8x8xf32>, vector<1x8x8xf32>, vector<1x8x8xf32> -> vector<1x8x8xf32>
    "tpu.trace_stop"() : () -> ()
    %97 = tpu.concatenate %39, %58, %77, %96 in 2 : vector<1x8x8xf32>, vector<1x8x8xf32>, vector<1x8x8xf32>, vector<1x8x8xf32> -> vector<1x8x32xf32>
    %98 = vector.shape_cast %97 : vector<1x8x32xf32> to vector<8x32xf32>
    %99 = arith.truncf %98 : vector<8x32xf32> to vector<8x32xbf16>
    %c0_34 = arith.constant 0 : index
    %c0_35 = arith.constant 0 : index
    %c0_36 = arith.constant 0 : index
    %100 = vector.load %arg7[%c0_34, %c0_35, %c0_36] : memref<2x32x32xbf16, #tpu.memory_space<vmem>>, vector<1x32x32xbf16>
    %101 = vector.shape_cast %100 : vector<1x32x32xbf16> to vector<32x32xbf16>
    %cst_37 = arith.constant dense<0.000000e+00> : vector<8x32xf32>
    %102 = tpu.matmul %99, %101, %cst_37 {dimension_numbers = #tpu.dot_dimension_numbers<[1], [0], [0], [1], [0, 0, 1, 1], [], []>} : vector<8x32xbf16>, vector<32x32xbf16>, vector<8x32xf32> -> vector<8x32xf32>
    %c0_38 = arith.constant 0 : index
    %c0_39 = arith.constant 0 : index
    %c0_40 = arith.constant 0 : index
    %103 = vector.load %arg8[%c0_38, %c0_39, %c0_40] : memref<2x1x32xf32, #tpu.memory_space<vmem>>, vector<1x1x32xf32>
    %104 = vector.shape_cast %103 : vector<1x1x32xf32> to vector<1x32xf32>
    %105 = vector.broadcast %104 : vector<1x32xf32> to vector<8x32xf32>
    %106 = arith.addf %102, %105 : vector<8x32xf32>
    %107 = arith.addf %12, %106 : vector<8x32xf32>
    %c0_41 = arith.constant 0 : index
    %c0_42 = arith.constant 0 : index
    %c0_43 = arith.constant 0 : index
    %108 = vector.load %arg9[%c0_41, %c0_42, %c0_43] : memref<2x1x32xf32, #tpu.memory_space<vmem>>, vector<1x1x32xf32>
    %109 = vector.shape_cast %108 : vector<1x1x32xf32> to vector<1x32xf32>
    %c0_44 = arith.constant 0 : index
    %c0_45 = arith.constant 0 : index
    %c0_46 = arith.constant 0 : index
    %110 = vector.load %arg10[%c0_44, %c0_45, %c0_46] : memref<2x1x32xf32, #tpu.memory_space<vmem>>, vector<1x1x32xf32>
    %111 = vector.shape_cast %110 : vector<1x1x32xf32> to vector<1x32xf32>
    %cst_47 = arith.constant dense<0.000000e+00> : vector<8xf32>
    %112 = vector.multi_reduction <add>, %107, %cst_47 [1] : vector<8x32xf32> to vector<8xf32>
    %113 = vector.shape_cast %112 : vector<8xf32> to vector<8x1xf32>
    %cst_48 = arith.constant 3.200000e+01 : f32
    %114 = vector.broadcast %cst_48 : f32 to vector<8x1xf32>
    %115 = arith.divf %113, %114 : vector<8x1xf32>
    %116 = vector.broadcast %115 : vector<8x1xf32> to vector<8x32xf32>
    %117 = arith.subf %107, %116 : vector<8x32xf32>
    %118 = arith.mulf %117, %117 : vector<8x32xf32>
    %cst_49 = arith.constant dense<0.000000e+00> : vector<8xf32>
    %119 = vector.multi_reduction <add>, %118, %cst_49 [1] : vector<8x32xf32> to vector<8xf32>
    %120 = vector.shape_cast %119 : vector<8xf32> to vector<8x1xf32>
    %cst_50 = arith.constant 3.200000e+01 : f32
    %121 = vector.broadcast %cst_50 : f32 to vector<8x1xf32>
    %122 = arith.divf %120, %121 : vector<8x1xf32>
    %123 = vector.broadcast %115 : vector<8x1xf32> to vector<8x32xf32>
    %124 = arith.subf %107, %123 : vector<8x32xf32>
    %cst_51 = arith.constant 9.99999974E-6 : f32
    %125 = vector.broadcast %cst_51 : f32 to vector<8x1xf32>
    %126 = arith.addf %122, %125 : vector<8x1xf32>
    %127 = math.rsqrt %126 : vector<8x1xf32>
    %128 = vector.broadcast %127 : vector<8x1xf32> to vector<8x32xf32>
    %129 = arith.mulf %124, %128 : vector<8x32xf32>
    %130 = vector.broadcast %109 : vector<1x32xf32> to vector<8x32xf32>
    %131 = arith.mulf %129, %130 : vector<8x32xf32>
    %132 = vector.broadcast %111 : vector<1x32xf32> to vector<8x32xf32>
    %133 = arith.addf %131, %132 : vector<8x32xf32>
    %134 = arith.truncf %133 : vector<8x32xf32> to vector<8x32xbf16>
    %c0_52 = arith.constant 0 : index
    %c0_53 = arith.constant 0 : index
    %c0_54 = arith.constant 0 : index
    %135 = vector.load %arg11[%c0_52, %c0_53, %c0_54] : memref<2x32x64xbf16, #tpu.memory_space<vmem>>, vector<1x32x64xbf16>
    %136 = vector.shape_cast %135 : vector<1x32x64xbf16> to vector<32x64xbf16>
    %cst_55 = arith.constant dense<0.000000e+00> : vector<8x64xf32>
    %137 = tpu.matmul %134, %136, %cst_55 {dimension_numbers = #tpu.dot_dimension_numbers<[1], [0], [0], [1], [0, 0, 1, 1], [], []>} : vector<8x32xbf16>, vector<32x64xbf16>, vector<8x64xf32> -> vector<8x64xf32>
    %c0_56 = arith.constant 0 : index
    %c0_57 = arith.constant 0 : index
    %c0_58 = arith.constant 0 : index
    %138 = vector.load %arg12[%c0_56, %c0_57, %c0_58] : memref<2x1x64xf32, #tpu.memory_space<vmem>>, vector<1x1x64xf32>
    %139 = vector.shape_cast %138 : vector<1x1x64xf32> to vector<1x64xf32>
    %140 = vector.broadcast %139 : vector<1x64xf32> to vector<8x64xf32>
    %141 = arith.addf %137, %140 : vector<8x64xf32>
    %cst_59 = arith.constant 0.000000e+00 : f32
    %142 = vector.broadcast %cst_59 : f32 to vector<8x64xf32>
    %143 = arith.maximumf %141, %142 : vector<8x64xf32>
    %144 = arith.truncf %143 : vector<8x64xf32> to vector<8x64xbf16>
    %c0_60 = arith.constant 0 : index
    %c0_61 = arith.constant 0 : index
    %c0_62 = arith.constant 0 : index
    %145 = vector.load %arg13[%c0_60, %c0_61, %c0_62] : memref<2x64x32xbf16, #tpu.memory_space<vmem>>, vector<1x64x32xbf16>
    %146 = vector.shape_cast %145 : vector<1x64x32xbf16> to vector<64x32xbf16>
    %cst_63 = arith.constant dense<0.000000e+00> : vector<8x32xf32>
    %147 = tpu.matmul %144, %146, %cst_63 {dimension_numbers = #tpu.dot_dimension_numbers<[1], [0], [0], [1], [0, 0, 1, 1], [], []>} : vector<8x64xbf16>, vector<64x32xbf16>, vector<8x32xf32> -> vector<8x32xf32>
    %c0_64 = arith.constant 0 : index
    %c0_65 = arith.constant 0 : index
    %c0_66 = arith.constant 0 : index
    %148 = vector.load %arg14[%c0_64, %c0_65, %c0_66] : memref<2x1x32xf32, #tpu.memory_space<vmem>>, vector<1x1x32xf32>
    %149 = vector.shape_cast %148 : vector<1x1x32xf32> to vector<1x32xf32>
    %150 = vector.broadcast %149 : vector<1x32xf32> to vector<8x32xf32>
    %151 = arith.addf %147, %150 : vector<8x32xf32>
    %152 = arith.addf %133, %151 : vector<8x32xf32>
    %c0_67 = arith.constant 0 : index
    %c0_68 = arith.constant 0 : index
    %c0_69 = arith.constant 0 : index
    %153 = vector.load %arg15[%c0_67, %c0_68, %c0_69] : memref<2x1x32xf32, #tpu.memory_space<vmem>>, vector<1x1x32xf32>
    %154 = vector.shape_cast %153 : vector<1x1x32xf32> to vector<1x32xf32>
    %c0_70 = arith.constant 0 : index
    %c0_71 = arith.constant 0 : index
    %c0_72 = arith.constant 0 : index
    %155 = vector.load %arg16[%c0_70, %c0_71, %c0_72] : memref<2x1x32xf32, #tpu.memory_space<vmem>>, vector<1x1x32xf32>
    %156 = vector.shape_cast %155 : vector<1x1x32xf32> to vector<1x32xf32>
    %cst_73 = arith.constant dense<0.000000e+00> : vector<8xf32>
    %157 = vector.multi_reduction <add>, %152, %cst_73 [1] : vector<8x32xf32> to vector<8xf32>
    %158 = vector.shape_cast %157 : vector<8xf32> to vector<8x1xf32>
    %cst_74 = arith.constant 3.200000e+01 : f32
    %159 = vector.broadcast %cst_74 : f32 to vector<8x1xf32>
    %160 = arith.divf %158, %159 : vector<8x1xf32>
    %161 = vector.broadcast %160 : vector<8x1xf32> to vector<8x32xf32>
    %162 = arith.subf %152, %161 : vector<8x32xf32>
    %163 = arith.mulf %162, %162 : vector<8x32xf32>
    %cst_75 = arith.constant dense<0.000000e+00> : vector<8xf32>
    %164 = vector.multi_reduction <add>, %163, %cst_75 [1] : vector<8x32xf32> to vector<8xf32>
    %165 = vector.shape_cast %164 : vector<8xf32> to vector<8x1xf32>
    %cst_76 = arith.constant 3.200000e+01 : f32
    %166 = vector.broadcast %cst_76 : f32 to vector<8x1xf32>
    %167 = arith.divf %165, %166 : vector<8x1xf32>
    %168 = vector.broadcast %160 : vector<8x1xf32> to vector<8x32xf32>
    %169 = arith.subf %152, %168 : vector<8x32xf32>
    %cst_77 = arith.constant 9.99999974E-6 : f32
    %170 = vector.broadcast %cst_77 : f32 to vector<8x1xf32>
    %171 = arith.addf %167, %170 : vector<8x1xf32>
    %172 = math.rsqrt %171 : vector<8x1xf32>
    %173 = vector.broadcast %172 : vector<8x1xf32> to vector<8x32xf32>
    %174 = arith.mulf %169, %173 : vector<8x32xf32>
    %175 = vector.broadcast %154 : vector<1x32xf32> to vector<8x32xf32>
    %176 = arith.mulf %174, %175 : vector<8x32xf32>
    %177 = vector.broadcast %156 : vector<1x32xf32> to vector<8x32xf32>
    %178 = arith.addf %176, %177 : vector<8x32xf32>
    %179 = arith.truncf %178 : vector<8x32xf32> to vector<8x32xbf16>
    %c1 = arith.constant 1 : index
    %c0_78 = arith.constant 0 : index
    %c0_79 = arith.constant 0 : index
    %180 = vector.load %arg5[%c1, %c0_78, %c0_79] : memref<2x32x96xbf16, #tpu.memory_space<vmem>>, vector<1x32x96xbf16>
    %181 = vector.shape_cast %180 : vector<1x32x96xbf16> to vector<32x96xbf16>
    %cst_80 = arith.constant dense<0.000000e+00> : vector<8x96xf32>
    %182 = tpu.matmul %179, %181, %cst_80 {dimension_numbers = #tpu.dot_dimension_numbers<[1], [0], [0], [1], [0, 0, 1, 1], [], []>} : vector<8x32xbf16>, vector<32x96xbf16>, vector<8x96xf32> -> vector<8x96xf32>
    %c1_81 = arith.constant 1 : index
    %c0_82 = arith.constant 0 : index
    %c0_83 = arith.constant 0 : index
    %183 = vector.load %arg6[%c1_81, %c0_82, %c0_83] : memref<2x1x96xf32, #tpu.memory_space<vmem>>, vector<1x1x96xf32>
    %184 = vector.shape_cast %183 : vector<1x1x96xf32> to vector<1x96xf32>
    %185 = vector.broadcast %184 : vector<1x96xf32> to vector<8x96xf32>
    %186 = arith.addf %182, %185 : vector<8x96xf32>
    %187 = vector.extract_strided_slice %186 {offsets = [0, 0], sizes = [8, 8], strides = [1, 1]} : vector<8x96xf32> to vector<8x8xf32>
    %188 = vector.shape_cast %187 : vector<8x8xf32> to vector<1x8x8xf32>
    %189 = vector.extract_strided_slice %186 {offsets = [0, 32], sizes = [8, 8], strides = [1, 1]} : vector<8x96xf32> to vector<8x8xf32>
    %190 = vector.shape_cast %189 : vector<8x8xf32> to vector<1x8x8xf32>
    %191 = vector.extract_strided_slice %186 {offsets = [0, 64], sizes = [8, 8], strides = [1, 1]} : vector<8x96xf32> to vector<8x8xf32>
    %192 = vector.shape_cast %191 : vector<8x8xf32> to vector<1x8x8xf32>
    "tpu.trace_start"() <{level = 10 : i32, message = "bqd,bkd->bqk"}> : () -> ()
    %cst_84 = arith.constant dense<0.000000e+00> : vector<1x8x8xf32>
    %193 = tpu.matmul %188, %190, %cst_84 {dimension_numbers = #tpu.dot_dimension_numbers<[2], [2], [1], [1], [0, 0, 0, 1, 1, 1], [0], [0]>} : vector<1x8x8xf32>, vector<1x8x8xf32>, vector<1x8x8xf32> -> vector<1x8x8xf32>
    "tpu.trace_stop"() : () -> ()
    %194 = vector.broadcast %6 : vector<1x1x8xf32> to vector<1x8x8xf32>
    %195 = arith.addf %193, %194 : vector<1x8x8xf32>
    %cst_85 = arith.constant dense<0xFF800000> : vector<1x8xf32>
    %196 = vector.multi_reduction <maximumf>, %195, %cst_85 [2] : vector<1x8x8xf32> to vector<1x8xf32>
    %197 = vector.shape_cast %196 : vector<1x8xf32> to vector<1x8x1xf32>
    %198 = vector.broadcast %197 : vector<1x8x1xf32> to vector<1x8x8xf32>
    %199 = arith.subf %195, %198 : vector<1x8x8xf32>
    %200 = math.exp %199 : vector<1x8x8xf32>
    %cst_86 = arith.constant dense<0.000000e+00> : vector<1x8xf32>
    %201 = vector.multi_reduction <add>, %200, %cst_86 [2] : vector<1x8x8xf32> to vector<1x8xf32>
    %202 = vector.shape_cast %201 : vector<1x8xf32> to vector<1x8x1xf32>
    %203 = vector.broadcast %202 : vector<1x8x1xf32> to vector<1x8x8xf32>
    %204 = arith.divf %200, %203 : vector<1x8x8xf32>
    "tpu.trace_start"() <{level = 10 : i32, message = "bqk,bkd->bqd"}> : () -> ()
    %cst_87 = arith.constant dense<0.000000e+00> : vector<1x8x8xf32>
    %205 = tpu.matmul %204, %192, %cst_87 {dimension_numbers = #tpu.dot_dimension_numbers<[2], [1], [1], [2], [0, 0, 0, 1, 1, 2], [0], [0]>} : vector<1x8x8xf32>, vector<1x8x8xf32>, vector<1x8x8xf32> -> vector<1x8x8xf32>
    "tpu.trace_stop"() : () -> ()
    %206 = vector.extract_strided_slice %186 {offsets = [0, 8], sizes = [8, 8], strides = [1, 1]} : vector<8x96xf32> to vector<8x8xf32>
    %207 = vector.shape_cast %206 : vector<8x8xf32> to vector<1x8x8xf32>
    %208 = vector.extract_strided_slice %186 {offsets = [0, 40], sizes = [8, 8], strides = [1, 1]} : vector<8x96xf32> to vector<8x8xf32>
    %209 = vector.shape_cast %208 : vector<8x8xf32> to vector<1x8x8xf32>
    %210 = vector.extract_strided_slice %186 {offsets = [0, 72], sizes = [8, 8], strides = [1, 1]} : vector<8x96xf32> to vector<8x8xf32>
    %211 = vector.shape_cast %210 : vector<8x8xf32> to vector<1x8x8xf32>
    "tpu.trace_start"() <{level = 10 : i32, message = "bqd,bkd->bqk"}> : () -> ()
    %cst_88 = arith.constant dense<0.000000e+00> : vector<1x8x8xf32>
    %212 = tpu.matmul %207, %209, %cst_88 {dimension_numbers = #tpu.dot_dimension_numbers<[2], [2], [1], [1], [0, 0, 0, 1, 1, 1], [0], [0]>} : vector<1x8x8xf32>, vector<1x8x8xf32>, vector<1x8x8xf32> -> vector<1x8x8xf32>
    "tpu.trace_stop"() : () -> ()
    %213 = vector.broadcast %6 : vector<1x1x8xf32> to vector<1x8x8xf32>
    %214 = arith.addf %212, %213 : vector<1x8x8xf32>
    %cst_89 = arith.constant dense<0xFF800000> : vector<1x8xf32>
    %215 = vector.multi_reduction <maximumf>, %214, %cst_89 [2] : vector<1x8x8xf32> to vector<1x8xf32>
    %216 = vector.shape_cast %215 : vector<1x8xf32> to vector<1x8x1xf32>
    %217 = vector.broadcast %216 : vector<1x8x1xf32> to vector<1x8x8xf32>
    %218 = arith.subf %214, %217 : vector<1x8x8xf32>
    %219 = math.exp %218 : vector<1x8x8xf32>
    %cst_90 = arith.constant dense<0.000000e+00> : vector<1x8xf32>
    %220 = vector.multi_reduction <add>, %219, %cst_90 [2] : vector<1x8x8xf32> to vector<1x8xf32>
    %221 = vector.shape_cast %220 : vector<1x8xf32> to vector<1x8x1xf32>
    %222 = vector.broadcast %221 : vector<1x8x1xf32> to vector<1x8x8xf32>
    %223 = arith.divf %219, %222 : vector<1x8x8xf32>
    "tpu.trace_start"() <{level = 10 : i32, message = "bqk,bkd->bqd"}> : () -> ()
    %cst_91 = arith.constant dense<0.000000e+00> : vector<1x8x8xf32>
    %224 = tpu.matmul %223, %211, %cst_91 {dimension_numbers = #tpu.dot_dimension_numbers<[2], [1], [1], [2], [0, 0, 0, 1, 1, 2], [0], [0]>} : vector<1x8x8xf32>, vector<1x8x8xf32>, vector<1x8x8xf32> -> vector<1x8x8xf32>
    "tpu.trace_stop"() : () -> ()
    %225 = vector.extract_strided_slice %186 {offsets = [0, 16], sizes = [8, 8], strides = [1, 1]} : vector<8x96xf32> to vector<8x8xf32>
    %226 = vector.shape_cast %225 : vector<8x8xf32> to vector<1x8x8xf32>
    %227 = vector.extract_strided_slice %186 {offsets = [0, 48], sizes = [8, 8], strides = [1, 1]} : vector<8x96xf32> to vector<8x8xf32>
    %228 = vector.shape_cast %227 : vector<8x8xf32> to vector<1x8x8xf32>
    %229 = vector.extract_strided_slice %186 {offsets = [0, 80], sizes = [8, 8], strides = [1, 1]} : vector<8x96xf32> to vector<8x8xf32>
    %230 = vector.shape_cast %229 : vector<8x8xf32> to vector<1x8x8xf32>
    "tpu.trace_start"() <{level = 10 : i32, message = "bqd,bkd->bqk"}> : () -> ()
    %cst_92 = arith.constant dense<0.000000e+00> : vector<1x8x8xf32>
    %231 = tpu.matmul %226, %228, %cst_92 {dimension_numbers = #tpu.dot_dimension_numbers<[2], [2], [1], [1], [0, 0, 0, 1, 1, 1], [0], [0]>} : vector<1x8x8xf32>, vector<1x8x8xf32>, vector<1x8x8xf32> -> vector<1x8x8xf32>
    "tpu.trace_stop"() : () -> ()
    %232 = vector.broadcast %6 : vector<1x1x8xf32> to vector<1x8x8xf32>
    %233 = arith.addf %231, %232 : vector<1x8x8xf32>
    %cst_93 = arith.constant dense<0xFF800000> : vector<1x8xf32>
    %234 = vector.multi_reduction <maximumf>, %233, %cst_93 [2] : vector<1x8x8xf32> to vector<1x8xf32>
    %235 = vector.shape_cast %234 : vector<1x8xf32> to vector<1x8x1xf32>
    %236 = vector.broadcast %235 : vector<1x8x1xf32> to vector<1x8x8xf32>
    %237 = arith.subf %233, %236 : vector<1x8x8xf32>
    %238 = math.exp %237 : vector<1x8x8xf32>
    %cst_94 = arith.constant dense<0.000000e+00> : vector<1x8xf32>
    %239 = vector.multi_reduction <add>, %238, %cst_94 [2] : vector<1x8x8xf32> to vector<1x8xf32>
    %240 = vector.shape_cast %239 : vector<1x8xf32> to vector<1x8x1xf32>
    %241 = vector.broadcast %240 : vector<1x8x1xf32> to vector<1x8x8xf32>
    %242 = arith.divf %238, %241 : vector<1x8x8xf32>
    "tpu.trace_start"() <{level = 10 : i32, message = "bqk,bkd->bqd"}> : () -> ()
    %cst_95 = arith.constant dense<0.000000e+00> : vector<1x8x8xf32>
    %243 = tpu.matmul %242, %230, %cst_95 {dimension_numbers = #tpu.dot_dimension_numbers<[2], [1], [1], [2], [0, 0, 0, 1, 1, 2], [0], [0]>} : vector<1x8x8xf32>, vector<1x8x8xf32>, vector<1x8x8xf32> -> vector<1x8x8xf32>
    "tpu.trace_stop"() : () -> ()
    %244 = vector.extract_strided_slice %186 {offsets = [0, 24], sizes = [8, 8], strides = [1, 1]} : vector<8x96xf32> to vector<8x8xf32>
    %245 = vector.shape_cast %244 : vector<8x8xf32> to vector<1x8x8xf32>
    %246 = vector.extract_strided_slice %186 {offsets = [0, 56], sizes = [8, 8], strides = [1, 1]} : vector<8x96xf32> to vector<8x8xf32>
    %247 = vector.shape_cast %246 : vector<8x8xf32> to vector<1x8x8xf32>
    %248 = vector.extract_strided_slice %186 {offsets = [0, 88], sizes = [8, 8], strides = [1, 1]} : vector<8x96xf32> to vector<8x8xf32>
    %249 = vector.shape_cast %248 : vector<8x8xf32> to vector<1x8x8xf32>
    "tpu.trace_start"() <{level = 10 : i32, message = "bqd,bkd->bqk"}> : () -> ()
    %cst_96 = arith.constant dense<0.000000e+00> : vector<1x8x8xf32>
    %250 = tpu.matmul %245, %247, %cst_96 {dimension_numbers = #tpu.dot_dimension_numbers<[2], [2], [1], [1], [0, 0, 0, 1, 1, 1], [0], [0]>} : vector<1x8x8xf32>, vector<1x8x8xf32>, vector<1x8x8xf32> -> vector<1x8x8xf32>
    "tpu.trace_stop"() : () -> ()
    %251 = vector.broadcast %6 : vector<1x1x8xf32> to vector<1x8x8xf32>
    %252 = arith.addf %250, %251 : vector<1x8x8xf32>
    %cst_97 = arith.constant dense<0xFF800000> : vector<1x8xf32>
    %253 = vector.multi_reduction <maximumf>, %252, %cst_97 [2] : vector<1x8x8xf32> to vector<1x8xf32>
    %254 = vector.shape_cast %253 : vector<1x8xf32> to vector<1x8x1xf32>
    %255 = vector.broadcast %254 : vector<1x8x1xf32> to vector<1x8x8xf32>
    %256 = arith.subf %252, %255 : vector<1x8x8xf32>
    %257 = math.exp %256 : vector<1x8x8xf32>
    %cst_98 = arith.constant dense<0.000000e+00> : vector<1x8xf32>
    %258 = vector.multi_reduction <add>, %257, %cst_98 [2] : vector<1x8x8xf32> to vector<1x8xf32>
    %259 = vector.shape_cast %258 : vector<1x8xf32> to vector<1x8x1xf32>
    %260 = vector.broadcast %259 : vector<1x8x1xf32> to vector<1x8x8xf32>
    %261 = arith.divf %257, %260 : vector<1x8x8xf32>
    "tpu.trace_start"() <{level = 10 : i32, message = "bqk,bkd->bqd"}> : () -> ()
    %cst_99 = arith.constant dense<0.000000e+00> : vector<1x8x8xf32>
    %262 = tpu.matmul %261, %249, %cst_99 {dimension_numbers = #tpu.dot_dimension_numbers<[2], [1], [1], [2], [0, 0, 0, 1, 1, 2], [0], [0]>} : vector<1x8x8xf32>, vector<1x8x8xf32>, vector<1x8x8xf32> -> vector<1x8x8xf32>
    "tpu.trace_stop"() : () -> ()
    %263 = tpu.concatenate %205, %224, %243, %262 in 2 : vector<1x8x8xf32>, vector<1x8x8xf32>, vector<1x8x8xf32>, vector<1x8x8xf32> -> vector<1x8x32xf32>
    %264 = vector.shape_cast %263 : vector<1x8x32xf32> to vector<8x32xf32>
    %265 = arith.truncf %264 : vector<8x32xf32> to vector<8x32xbf16>
    %c1_100 = arith.constant 1 : index
    %c0_101 = arith.constant 0 : index
    %c0_102 = arith.constant 0 : index
    %266 = vector.load %arg7[%c1_100, %c0_101, %c0_102] : memref<2x32x32xbf16, #tpu.memory_space<vmem>>, vector<1x32x32xbf16>
    %267 = vector.shape_cast %266 : vector<1x32x32xbf16> to vector<32x32xbf16>
    %cst_103 = arith.constant dense<0.000000e+00> : vector<8x32xf32>
    %268 = tpu.matmul %265, %267, %cst_103 {dimension_numbers = #tpu.dot_dimension_numbers<[1], [0], [0], [1], [0, 0, 1, 1], [], []>} : vector<8x32xbf16>, vector<32x32xbf16>, vector<8x32xf32> -> vector<8x32xf32>
    %c1_104 = arith.constant 1 : index
    %c0_105 = arith.constant 0 : index
    %c0_106 = arith.constant 0 : index
    %269 = vector.load %arg8[%c1_104, %c0_105, %c0_106] : memref<2x1x32xf32, #tpu.memory_space<vmem>>, vector<1x1x32xf32>
    %270 = vector.shape_cast %269 : vector<1x1x32xf32> to vector<1x32xf32>
    %271 = vector.broadcast %270 : vector<1x32xf32> to vector<8x32xf32>
    %272 = arith.addf %268, %271 : vector<8x32xf32>
    %273 = arith.addf %178, %272 : vector<8x32xf32>
    %c1_107 = arith.constant 1 : index
    %c0_108 = arith.constant 0 : index
    %c0_109 = arith.constant 0 : index
    %274 = vector.load %arg9[%c1_107, %c0_108, %c0_109] : memref<2x1x32xf32, #tpu.memory_space<vmem>>, vector<1x1x32xf32>
    %275 = vector.shape_cast %274 : vector<1x1x32xf32> to vector<1x32xf32>
    %c1_110 = arith.constant 1 : index
    %c0_111 = arith.constant 0 : index
    %c0_112 = arith.constant 0 : index
    %276 = vector.load %arg10[%c1_110, %c0_111, %c0_112] : memref<2x1x32xf32, #tpu.memory_space<vmem>>, vector<1x1x32xf32>
    %277 = vector.shape_cast %276 : vector<1x1x32xf32> to vector<1x32xf32>
    %cst_113 = arith.constant dense<0.000000e+00> : vector<8xf32>
    %278 = vector.multi_reduction <add>, %273, %cst_113 [1] : vector<8x32xf32> to vector<8xf32>
    %279 = vector.shape_cast %278 : vector<8xf32> to vector<8x1xf32>
    %cst_114 = arith.constant 3.200000e+01 : f32
    %280 = vector.broadcast %cst_114 : f32 to vector<8x1xf32>
    %281 = arith.divf %279, %280 : vector<8x1xf32>
    %282 = vector.broadcast %281 : vector<8x1xf32> to vector<8x32xf32>
    %283 = arith.subf %273, %282 : vector<8x32xf32>
    %284 = arith.mulf %283, %283 : vector<8x32xf32>
    %cst_115 = arith.constant dense<0.000000e+00> : vector<8xf32>
    %285 = vector.multi_reduction <add>, %284, %cst_115 [1] : vector<8x32xf32> to vector<8xf32>
    %286 = vector.shape_cast %285 : vector<8xf32> to vector<8x1xf32>
    %cst_116 = arith.constant 3.200000e+01 : f32
    %287 = vector.broadcast %cst_116 : f32 to vector<8x1xf32>
    %288 = arith.divf %286, %287 : vector<8x1xf32>
    %289 = vector.broadcast %281 : vector<8x1xf32> to vector<8x32xf32>
    %290 = arith.subf %273, %289 : vector<8x32xf32>
    %cst_117 = arith.constant 9.99999974E-6 : f32
    %291 = vector.broadcast %cst_117 : f32 to vector<8x1xf32>
    %292 = arith.addf %288, %291 : vector<8x1xf32>
    %293 = math.rsqrt %292 : vector<8x1xf32>
    %294 = vector.broadcast %293 : vector<8x1xf32> to vector<8x32xf32>
    %295 = arith.mulf %290, %294 : vector<8x32xf32>
    %296 = vector.broadcast %275 : vector<1x32xf32> to vector<8x32xf32>
    %297 = arith.mulf %295, %296 : vector<8x32xf32>
    %298 = vector.broadcast %277 : vector<1x32xf32> to vector<8x32xf32>
    %299 = arith.addf %297, %298 : vector<8x32xf32>
    %300 = arith.truncf %299 : vector<8x32xf32> to vector<8x32xbf16>
    %c1_118 = arith.constant 1 : index
    %c0_119 = arith.constant 0 : index
    %c0_120 = arith.constant 0 : index
    %301 = vector.load %arg11[%c1_118, %c0_119, %c0_120] : memref<2x32x64xbf16, #tpu.memory_space<vmem>>, vector<1x32x64xbf16>
    %302 = vector.shape_cast %301 : vector<1x32x64xbf16> to vector<32x64xbf16>
    %cst_121 = arith.constant dense<0.000000e+00> : vector<8x64xf32>
    %303 = tpu.matmul %300, %302, %cst_121 {dimension_numbers = #tpu.dot_dimension_numbers<[1], [0], [0], [1], [0, 0, 1, 1], [], []>} : vector<8x32xbf16>, vector<32x64xbf16>, vector<8x64xf32> -> vector<8x64xf32>
    %c1_122 = arith.constant 1 : index
    %c0_123 = arith.constant 0 : index
    %c0_124 = arith.constant 0 : index
    %304 = vector.load %arg12[%c1_122, %c0_123, %c0_124] : memref<2x1x64xf32, #tpu.memory_space<vmem>>, vector<1x1x64xf32>
    %305 = vector.shape_cast %304 : vector<1x1x64xf32> to vector<1x64xf32>
    %306 = vector.broadcast %305 : vector<1x64xf32> to vector<8x64xf32>
    %307 = arith.addf %303, %306 : vector<8x64xf32>
    %cst_125 = arith.constant 0.000000e+00 : f32
    %308 = vector.broadcast %cst_125 : f32 to vector<8x64xf32>
    %309 = arith.maximumf %307, %308 : vector<8x64xf32>
    %310 = arith.truncf %309 : vector<8x64xf32> to vector<8x64xbf16>
    %c1_126 = arith.constant 1 : index
    %c0_127 = arith.constant 0 : index
    %c0_128 = arith.constant 0 : index
    %311 = vector.load %arg13[%c1_126, %c0_127, %c0_128] : memref<2x64x32xbf16, #tpu.memory_space<vmem>>, vector<1x64x32xbf16>
    %312 = vector.shape_cast %311 : vector<1x64x32xbf16> to vector<64x32xbf16>
    %cst_129 = arith.constant dense<0.000000e+00> : vector<8x32xf32>
    %313 = tpu.matmul %310, %312, %cst_129 {dimension_numbers = #tpu.dot_dimension_numbers<[1], [0], [0], [1], [0, 0, 1, 1], [], []>} : vector<8x64xbf16>, vector<64x32xbf16>, vector<8x32xf32> -> vector<8x32xf32>
    %c1_130 = arith.constant 1 : index
    %c0_131 = arith.constant 0 : index
    %c0_132 = arith.constant 0 : index
    %314 = vector.load %arg14[%c1_130, %c0_131, %c0_132] : memref<2x1x32xf32, #tpu.memory_space<vmem>>, vector<1x1x32xf32>
    %315 = vector.shape_cast %314 : vector<1x1x32xf32> to vector<1x32xf32>
    %316 = vector.broadcast %315 : vector<1x32xf32> to vector<8x32xf32>
    %317 = arith.addf %313, %316 : vector<8x32xf32>
    %318 = arith.addf %299, %317 : vector<8x32xf32>
    %c1_133 = arith.constant 1 : index
    %c0_134 = arith.constant 0 : index
    %c0_135 = arith.constant 0 : index
    %319 = vector.load %arg15[%c1_133, %c0_134, %c0_135] : memref<2x1x32xf32, #tpu.memory_space<vmem>>, vector<1x1x32xf32>
    %320 = vector.shape_cast %319 : vector<1x1x32xf32> to vector<1x32xf32>
    %c1_136 = arith.constant 1 : index
    %c0_137 = arith.constant 0 : index
    %c0_138 = arith.constant 0 : index
    %321 = vector.load %arg16[%c1_136, %c0_137, %c0_138] : memref<2x1x32xf32, #tpu.memory_space<vmem>>, vector<1x1x32xf32>
    %322 = vector.shape_cast %321 : vector<1x1x32xf32> to vector<1x32xf32>
    %cst_139 = arith.constant dense<0.000000e+00> : vector<8xf32>
    %323 = vector.multi_reduction <add>, %318, %cst_139 [1] : vector<8x32xf32> to vector<8xf32>
    %324 = vector.shape_cast %323 : vector<8xf32> to vector<8x1xf32>
    %cst_140 = arith.constant 3.200000e+01 : f32
    %325 = vector.broadcast %cst_140 : f32 to vector<8x1xf32>
    %326 = arith.divf %324, %325 : vector<8x1xf32>
    %327 = vector.broadcast %326 : vector<8x1xf32> to vector<8x32xf32>
    %328 = arith.subf %318, %327 : vector<8x32xf32>
    %329 = arith.mulf %328, %328 : vector<8x32xf32>
    %cst_141 = arith.constant dense<0.000000e+00> : vector<8xf32>
    %330 = vector.multi_reduction <add>, %329, %cst_141 [1] : vector<8x32xf32> to vector<8xf32>
    %331 = vector.shape_cast %330 : vector<8xf32> to vector<8x1xf32>
    %cst_142 = arith.constant 3.200000e+01 : f32
    %332 = vector.broadcast %cst_142 : f32 to vector<8x1xf32>
    %333 = arith.divf %331, %332 : vector<8x1xf32>
    %334 = vector.broadcast %326 : vector<8x1xf32> to vector<8x32xf32>
    %335 = arith.subf %318, %334 : vector<8x32xf32>
    %cst_143 = arith.constant 9.99999974E-6 : f32
    %336 = vector.broadcast %cst_143 : f32 to vector<8x1xf32>
    %337 = arith.addf %333, %336 : vector<8x1xf32>
    %338 = math.rsqrt %337 : vector<8x1xf32>
    %339 = vector.broadcast %338 : vector<8x1xf32> to vector<8x32xf32>
    %340 = arith.mulf %335, %339 : vector<8x32xf32>
    %341 = vector.broadcast %320 : vector<1x32xf32> to vector<8x32xf32>
    %342 = arith.mulf %340, %341 : vector<8x32xf32>
    %343 = vector.broadcast %322 : vector<1x32xf32> to vector<8x32xf32>
    %344 = arith.addf %342, %343 : vector<8x32xf32>
    %345 = arith.truncf %344 : vector<8x32xf32> to vector<8x32xbf16>
    %c0_144 = arith.constant 0 : index
    %c0_145 = arith.constant 0 : index
    %346 = vector.load %arg17[%c0_144, %c0_145] : memref<32x128xbf16, #tpu.memory_space<vmem>>, vector<32x128xbf16>
    %cst_146 = arith.constant dense<0.000000e+00> : vector<8x128xf32>
    %347 = tpu.matmul %345, %346, %cst_146 {dimension_numbers = #tpu.dot_dimension_numbers<[1], [0], [0], [1], [0, 0, 1, 1], [], []>} : vector<8x32xbf16>, vector<32x128xbf16>, vector<8x128xf32> -> vector<8x128xf32>
    %c0_147 = arith.constant 0 : index
    %c0_148 = arith.constant 0 : index
    %348 = vector.load %arg18[%c0_147, %c0_148] : memref<1x128xf32, #tpu.memory_space<vmem>>, vector<1x128xf32>
    %349 = vector.broadcast %348 : vector<1x128xf32> to vector<8x128xf32>
    %350 = arith.addf %347, %349 : vector<8x128xf32>
    %351 = vector.shape_cast %350 : vector<8x128xf32> to vector<1x8x128xf32>
    %c0_149 = arith.constant 0 : index
    %c0_150 = arith.constant 0 : index
    %c0_151 = arith.constant 0 : index
    %352 = vector.load %arg21[%c0_149, %c0_150, %c0_151] : memref<1x8x128xf32, #tpu.memory_space<vmem>>, vector<1x8x128xf32>
    tpu.vector_store %arg21[%c0_149, %c0_150, %c0_151], %351 {strides = array<i32>} : memref<1x8x128xf32, #tpu.memory_space<vmem>>, vector<1x8x128xf32>,
    %353 = vector.shape_cast %344 : vector<8x32xf32> to vector<1x8x32xf32>
    %354 = vector.extract_strided_slice %353 {offsets = [0, 0, 0], sizes = [1, 1, 32], strides = [1, 1, 1]} : vector<1x8x32xf32> to vector<1x1x32xf32>
    %355 = vector.shape_cast %354 : vector<1x1x32xf32> to vector<1x32xf32>
    %356 = arith.truncf %355 : vector<1x32xf32> to vector<1x32xbf16>
    %c0_152 = arith.constant 0 : index
    %c0_153 = arith.constant 0 : index
    %357 = vector.load %arg19[%c0_152, %c0_153] : memref<32x256xbf16, #tpu.memory_space<vmem>>, vector<32x256xbf16>
    %cst_154 = arith.constant dense<0.000000e+00> : vector<1x256xf32>
    %358 = tpu.matmul %356, %357, %cst_154 {dimension_numbers = #tpu.dot_dimension_numbers<[1], [0], [0], [1], [0, 0, 1, 1], [], []>} : vector<1x32xbf16>, vector<32x256xbf16>, vector<1x256xf32> -> vector<1x256xf32>
    %c0_155 = arith.constant 0 : index
    %c0_156 = arith.constant 0 : index
    %359 = vector.load %arg20[%c0_155, %c0_156] : memref<1x256xf32, #tpu.memory_space<vmem>>, vector<1x256xf32>
    %360 = arith.addf %358, %359 : vector<1x256xf32>
    %361 = arith.negf %360 : vector<1x256xf32>
    %362 = math.exp %361 : vector<1x256xf32>
    %cst_157 = arith.constant 1.000000e+00 : f32
    %363 = vector.broadcast %cst_157 : f32 to vector<1x256xf32>
    %364 = arith.addf %363, %362 : vector<1x256xf32>
    %365 = arith.divf %363, %364 : vector<1x256xf32>
    %366 = tpu.concatenate %365, %355 in 1 : vector<1x256xf32>, vector<1x32xf32> -> vector<1x288xf32>
    %367 = vector.shape_cast %366 : vector<1x288xf32> to vector<1x1x288xf32>
    %c0_158 = arith.constant 0 : index
    %c0_159 = arith.constant 0 : index
    %c0_160 = arith.constant 0 : index
    %368 = vector.load %arg22[%c0_158, %c0_159, %c0_160] : memref<1x1x288xf32, #tpu.memory_space<vmem>>, vector<1x1x288xf32>
    tpu.vector_store %arg22[%c0_158, %c0_159, %c0_160], %367 {strides = array<i32>} : memref<1x1x288xf32, #tpu.memory_space<vmem>>, vector<1x1x288xf32>,
    return
  }
  func.func @transform_0(%arg0: i32) -> (i32, i32, i32) {
    %c0_i32 = arith.constant 0 : i32
    %c0_i32_0 = arith.constant 0 : i32
    %c0_i32_1 = arith.constant 0 : i32
    return %arg0, %c0_i32, %c0_i32_0 : i32, i32, i32
  }
  func.func @transform_1(%arg0: i32) -> (i32, i32, i32) {
    %c0_i32 = arith.constant 0 : i32
    %c0_i32_0 = arith.constant 0 : i32
    %c0_i32_1 = arith.constant 0 : i32
    return %arg0, %c0_i32, %c0_i32_0 : i32, i32, i32
  }
  func.func @transform_2(%arg0: i32) -> (i32, i32) {
    %c0_i32 = arith.constant 0 : i32
    %c0_i32_0 = arith.constant 0 : i32
    %c0_i32_1 = arith.constant 0 : i32
    return %c0_i32, %c0_i32_0 : i32, i32
  }
  func.func @transform_3(%arg0: i32) -> (i32, i32) {
    %c0_i32 = arith.constant 0 : i32
    %c0_i32_0 = arith.constant 0 : i32
    %c0_i32_1 = arith.constant 0 : i32
    return %c0_i32, %c0_i32_0 : i32, i32
  }
  func.func @transform_4(%arg0: i32) -> (i32, i32, i32) {
    %c0_i32 = arith.constant 0 : i32
    %c0_i32_0 = arith.constant 0 : i32
    %c0_i32_1 = arith.constant 0 : i32
    %c0_i32_2 = arith.constant 0 : i32
    return %c0_i32, %c0_i32_0, %c0_i32_1 : i32, i32, i32
  }
  func.func @transform_5(%arg0: i32) -> (i32, i32, i32) {
    %c0_i32 = arith.constant 0 : i32
    %c0_i32_0 = arith.constant 0 : i32
    %c0_i32_1 = arith.constant 0 : i32
    %c0_i32_2 = arith.constant 0 : i32
    return %c0_i32, %c0_i32_0, %c0_i32_1 : i32, i32, i32
  }
  func.func @transform_6(%arg0: i32) -> (i32, i32, i32) {
    %c0_i32 = arith.constant 0 : i32
    %c0_i32_0 = arith.constant 0 : i32
    %c0_i32_1 = arith.constant 0 : i32
    %c0_i32_2 = arith.constant 0 : i32
    return %c0_i32, %c0_i32_0, %c0_i32_1 : i32, i32, i32
  }
  func.func @transform_7(%arg0: i32) -> (i32, i32, i32) {
    %c0_i32 = arith.constant 0 : i32
    %c0_i32_0 = arith.constant 0 : i32
    %c0_i32_1 = arith.constant 0 : i32
    %c0_i32_2 = arith.constant 0 : i32
    return %c0_i32, %c0_i32_0, %c0_i32_1 : i32, i32, i32
  }
  func.func @transform_8(%arg0: i32) -> (i32, i32, i32) {
    %c0_i32 = arith.constant 0 : i32
    %c0_i32_0 = arith.constant 0 : i32
    %c0_i32_1 = arith.constant 0 : i32
    %c0_i32_2 = arith.constant 0 : i32
    return %c0_i32, %c0_i32_0, %c0_i32_1 : i32, i32, i32
  }
  func.func @transform_9(%arg0: i32) -> (i32, i32, i32) {
    %c0_i32 = arith.constant 0 : i32
    %c0_i32_0 = arith.constant 0 : i32
    %c0_i32_1 = arith.constant 0 : i32
    %c0_i32_2 = arith.constant 0 : i32
    return %c0_i32, %c0_i32_0, %c0_i32_1 : i32, i32, i32
  }
  func.func @transform_10(%arg0: i32) -> (i32, i32, i32) {
    %c0_i32 = arith.constant 0 : i32
    %c0_i32_0 = arith.constant 0 : i32
    %c0_i32_1 = arith.constant 0 : i32
    %c0_i32_2 = arith.constant 0 : i32
    return %c0_i32, %c0_i32_0, %c0_i32_1 : i32, i32, i32
  }
  func.func @transform_11(%arg0: i32) -> (i32, i32, i32) {
    %c0_i32 = arith.constant 0 : i32
    %c0_i32_0 = arith.constant 0 : i32
    %c0_i32_1 = arith.constant 0 : i32
    %c0_i32_2 = arith.constant 0 : i32
    return %c0_i32, %c0_i32_0, %c0_i32_1 : i32, i32, i32
  }
  func.func @transform_12(%arg0: i32) -> (i32, i32, i32) {
    %c0_i32 = arith.constant 0 : i32
    %c0_i32_0 = arith.constant 0 : i32
    %c0_i32_1 = arith.constant 0 : i32
    %c0_i32_2 = arith.constant 0 : i32
    return %c0_i32, %c0_i32_0, %c0_i32_1 : i32, i32, i32
  }
  func.func @transform_13(%arg0: i32) -> (i32, i32, i32) {
    %c0_i32 = arith.constant 0 : i32
    %c0_i32_0 = arith.constant 0 : i32
    %c0_i32_1 = arith.constant 0 : i32
    %c0_i32_2 = arith.constant 0 : i32
    return %c0_i32, %c0_i32_0, %c0_i32_1 : i32, i32, i32
  }
  func.func @transform_14(%arg0: i32) -> (i32, i32, i32) {
    %c0_i32 = arith.constant 0 : i32
    %c0_i32_0 = arith.constant 0 : i32
    %c0_i32_1 = arith.constant 0 : i32
    %c0_i32_2 = arith.constant 0 : i32
    return %c0_i32, %c0_i32_0, %c0_i32_1 : i32, i32, i32
  }
  func.func @transform_15(%arg0: i32) -> (i32, i32, i32) {
    %c0_i32 = arith.constant 0 : i32
    %c0_i32_0 = arith.constant 0 : i32
    %c0_i32_1 = arith.constant 0 : i32
    %c0_i32_2 = arith.constant 0 : i32
    return %c0_i32, %c0_i32_0, %c0_i32_1 : i32, i32, i32
  }
  func.func @transform_16(%arg0: i32) -> (i32, i32) {
    %c0_i32 = arith.constant 0 : i32
    %c0_i32_0 = arith.constant 0 : i32
    %c0_i32_1 = arith.constant 0 : i32
    return %c0_i32, %c0_i32_0 : i32, i32
  }
  func.func @transform_17(%arg0: i32) -> (i32, i32) {
    %c0_i32 = arith.constant 0 : i32
    %c0_i32_0 = arith.constant 0 : i32
    %c0_i32_1 = arith.constant 0 : i32
    return %c0_i32, %c0_i32_0 : i32, i32
  }
  func.func @transform_18(%arg0: i32) -> (i32, i32) {
    %c0_i32 = arith.constant 0 : i32
    %c0_i32_0 = arith.constant 0 : i32
    %c0_i32_1 = arith.constant 0 : i32
    return %c0_i32, %c0_i32_0 : i32, i32
  }
  func.func @transform_19(%arg0: i32) -> (i32, i32) {
    %c0_i32 = arith.constant 0 : i32
    %c0_i32_0 = arith.constant 0 : i32
    %c0_i32_1 = arith.constant 0 : i32
    return %c0_i32, %c0_i32_0 : i32, i32
  }
  func.func @transform_20(%arg0: i32) -> (i32, i32, i32) {
    %c0_i32 = arith.constant 0 : i32
    %c0_i32_0 = arith.constant 0 : i32
    %c0_i32_1 = arith.constant 0 : i32
    return %arg0, %c0_i32, %c0_i32_0 : i32, i32, i32
  }
  func.func @transform_21(%arg0: i32) -> (i32, i32, i32) {
    %c0_i32 = arith.constant 0 : i32
    %c0_i32_0 = arith.constant 0 : i32
    %c0_i32_1 = arith.constant 0 : i32
    return %arg0, %c0_i32, %c0_i32_0 : i32, i32, i32
  }
}

</mosaic_0001>

<bundles_post_ra>
// kernel: tpu_custom_call.1
= control target key start
LH: loop header
LB: loop body
LE: loop exit
PB: predicated region body
PF: predicated region fallthrough
CT: control target
= control target key end

     0   :  { %s3789_s0 = inlined_call_operand.hbm [shape: f32[2,8,16], index: 0, kind: input, shape index: {}]   ;;  %s3790_s1 = inlined_call_operand.hbm [shape: f32[2,1,8], index: 1, kind: input, shape index: {}]   ;;  %s3791_s2 = inlined_call_operand.hbm [shape: bf16[16,32], index: 2, kind: input, shape index: {}]   ;;  %s3792_s3 = inlined_call_operand.vmem [shape: f32[1,32], index: 3, kind: input, shape index: {}]   ;;  %s3793_s4 = inlined_call_operand.vmem [shape: bf16[2,32,96], index: 4, kind: input, shape index: {}]   ;;  %s3794_s5 = inlined_call_operand.vmem [shape: f32[2,1,96], index: 5, kind: input, shape index: {}]   ;;  %s3795_s6 = inlined_call_operand.vmem [shape: bf16[2,32,32], index: 6, kind: input, shape index: {}]   ;;  %s3796_s7 = inlined_call_operand.vmem [shape: f32[2,1,32], index: 7, kind: input, shape index: {}]   ;;  %s3797_s8 = inlined_call_operand.vmem [shape: f32[2,1,32], index: 8, kind: input, shape index: {}]   ;;  %s3798_s9 = inlined_call_operand.hbm [shape: f32[2,1,32], index: 9, kind: input, shape index: {}]   ;;  %s3799_s10 = inlined_call_operand.vmem [shape: bf16[2,32,64], index: 10, kind: input, shape index: {}]   ;;  %s3800_s11 = inlined_call_operand.vmem [shape: f32[2,1,64], index: 11, kind: input, shape index: {}]   ;;  %s3801_s12 = inlined_call_operand.vmem [shape: bf16[2,64,32], index: 12, kind: input, shape index: {}]   ;;  %s3802_s13 = inlined_call_operand.vmem [shape: f32[2,1,32], index: 13, kind: input, shape index: {}]   ;;  %s3803_s14 = inlined_call_operand.vmem [shape: f32[2,1,32], index: 14, kind: input, shape index: {}]   ;;  %s3804_s15 = inlined_call_operand.hbm [shape: f32[2,1,32], index: 15, kind: input, shape index: {}]   ;;  %s3805_s16 = inlined_call_operand.hbm [shape: bf16[32,128], index: 16, kind: input, shape index: {}]   ;;  %s3806_s17 = inlined_call_operand.hbm [shape: f32[1,128], index: 17, kind: input, shape index: {}]   ;;  %s3807_s18 = inlined_call_operand.hbm [shape: bf16[32,256], index: 18, kind: input, shape index: {}]   ;;  %s3808_s19 = inlined_call_operand.vmem [shape: f32[1,256], index: 19, kind: input, shape index: {}]   ;;  %s3809_s20 = inlined_call_operand.hbm [shape: f32[2,8,128], index: 20, kind: output, shape index: {0}]   ;;  %s3810_s21 = inlined_call_operand.hbm [shape: f32[2,1,288], index: 21, kind: output, shape index: {1}]  }
   0x1   :  { %3833 = sst [smem:[#allocation29_spill]] %s3789_s0 }
   0x2   :  { %3834 = sst [smem:[#allocation30_spill]] %s3790_s1 }
   0x3   :  { %3835 = sst [smem:[#allocation31_spill]] %s3791_s2 }
   0x4   :  { %3836 = sst [smem:[#allocation32_spill]] %s3792_s3 }
   0x5   :  { %3837 = sst [smem:[#allocation33_spill]] %s3793_s4 }
   0x6   :  { %3838 = sst [smem:[#allocation34_spill]] %s3794_s5 }
   0x7   :  { %3839 = sst [smem:[#allocation35_spill]] %s3797_s8 }
   0x8   :  { %3840 = sst [smem:[#allocation36_spill]] %s3798_s9 }
   0x9   :  { %3841 = sst [smem:[#allocation37_spill]] %s3800_s11 }
   0xa   :  { %3842 = sst [smem:[#allocation38_spill]] %s3801_s12 }
   0xb   :  { %3843 = sst [smem:[#allocation39_spill]] %s3802_s13 }
   0xc   :  { %3844 = sst [smem:[#allocation40_spill]] %s3803_s14 }
   0xd   :  { %3845 = sst [smem:[#allocation41_spill]] %s3804_s15 }
   0xe   :  { %3846 = sst [smem:[#allocation42_spill]] %s3805_s16 }
   0xf   :  { %3847 = sst [smem:[#allocation43_spill]] %s3806_s17 }
  0x10   :  { %3848 = sst [smem:[#allocation44_spill]] %s3807_s18 }
  0x11   :  { %3849 = sst [smem:[#allocation45_spill]] %s3808_s19 }
  0x12   :  { %3850 = sst [smem:[#allocation46_spill]] %s3809_s20 }
  0x13   :  { %3851 = sst [smem:[#allocation47_spill]] %s3810_s21 }
  0x14   :  { %27 = vsyncpa [#allocation3], 0 }
  0x15   :  { %29 = vsyncpa [#allocation3 + $0x1], 0 }
  0x16   :  { %30 = vsyncpa [#allocation6], 0 }
  0x17   :  { %32 = vsyncpa [#allocation6 + $0x1], 0 }
  0x18   :  { %33 = vsyncpa [#allocation9], 0 }
  0x19   :  { %34 = vsyncpa [#allocation12], 0 }
  0x1a   :  { %35 = vsyncpa [#allocation15], 0 }
  0x1b   :  { %36 = vsyncpa [#allocation4], 0 }
  0x1c   :  { %38 = vsyncpa [#allocation4 + $0x1], 0 }
  0x1d   :  { %39 = vsyncpa [#allocation18], 0 }
  0x1e   :  { %41 = vsyncpa [#allocation18 + $0x1], 0  ;;  %s3281_s2 = smov 0   ;;  %s3283_s25 = smov 0  }
  0x1f   :  { %s3285_s26 = smov 0   ;;  %s3287_s27 = smov 0  }
  0x20 LB: > { %3852 = sst [smem:[#allocation27_spill]] %s3138_s26  ;;  %s3305_s4 = sadd.s32 4294967295, %s3142_s27   ;;  %s3142_s27 = sphi %s3287_s27, %s3896_s27   ;;  %s3138_s26 = sphi %s3285_s26, %s3893_s26   ;;  %s3134_s25 = sphi %s3283_s25, %s3895_s25   ;;  %s3130_s2 = sphi %s3281_s2, %s3894_s2  }
  0x21   : > { %s3853_s29 = sld [smem:[#allocation31_spill]]  ;;  %p2354_p0 = scmp.ge.s32.totalorder %s3142_s27, 1 }
  0x22   : > { %p68_p1 = scmp.eq.s32.totalorder %s3305_s4, 0  ;;  %p534_p2 = scmp.lt.s32.totalorder %s3142_s27, 3 }
  0x23   : > { %s3144_s5 = smov [#allocation7]   ;;  %s3855_s9 = sld [smem:[#allocation36_spill]] }
  0x24   : > { %p3310_p3 = pnand %p2354_p0, %p534_p2  ;;  %s547_s22 = sshll.u32 %s3144_s5, 4  ;;  %s548_s22 = int_to_ptr.vmem [resolvable:$true] %s547_s22 }
  0x25   : > { %s3145_s28 = smov [#allocation8]   ;;  %s3146_s5 = smov 64  }
  0x26   : > { %p2610_p4 = pneg %p3310_p3  ;;  %s3147_s21 = smov 4  }
  0x27   : > { %s545_s0 = sshll.u32 %s3853_s29, 4  ;;  %s579_s29 = sshll.u32 %s3145_s28, 4  ;;  %s546_s0 = int_to_ptr.hbm [resolvable:$true] %s545_s0  ;;  %s580_s29 = int_to_ptr.vmem [resolvable:$true] %s579_s29 }
  0x28   : > { %p3322_p6 = pnand %p2610_p4, %p68_p1  ;;  %s3148_s20 = smov 16  }
  0x29   : > { %s577_s24 = sshll.u32 %s3855_s9, 4  ;;  %s3149_s23 = smov 1   ;;  %s578_s24 = int_to_ptr.hbm [resolvable:$true] %s577_s24 }
  0x2a   : > { %2613 = dma.hbm_to_vmem [thread:$0]  (!%p3322_p6), %s546_s0, 128, %s548_s22, [#allocation6], %s3146_s5, %s3146_s5, %s3147_s21  }
  0x2b   : > { %2616 = dma.hbm_to_vmem [thread:$0]  (!%p3322_p6), %s578_s24, 32, %s580_s29, [#allocation9], %s3148_s20, %s3148_s20, %s3149_s23  }
  0x2c   : > { %s3857_s16 = sld [smem:[#allocation42_spill]]  ;;  %s3150_s14 = smov [#allocation11]  }
  0x2d   : > { %s622_s13 = sshll.u32 %s3150_s14, 4  ;;  %s3858_s15 = sld [smem:[#allocation41_spill]]  ;;  %s623_s13 = int_to_ptr.vmem [resolvable:$true] %s622_s13 }
  0x2e   : > { %s3151_s0 = smov [#allocation10]   ;;  %s3859_s17 = sld [smem:[#allocation43_spill]] }
  0x2f   : > { %s608_s22 = sshll.u32 %s3151_s0, 4  ;;  %s3860_s18 = sld [smem:[#allocation44_spill]]  ;;  %s609_s22 = int_to_ptr.vmem [resolvable:$true] %s608_s22 }
  0x30   : > { %s3153_s12 = smov [#allocation14]   ;;  %s3155_s29 = smov 8  }
  0x31   : > { %s54_s28 = sadd.s32 1, %s3138_s26  ;;  %p61_p8 = scmp.ne.s32.totalorder %s3138_s26, %s3134_s25 }
  0x32   : > { %s620_s19 = sshll.u32 %s3857_s16, 4  ;;  %p62_p9 = scmp.eq.s32.totalorder %s3142_s27, 0  ;;  %s621_s19 = int_to_ptr.hbm [resolvable:$true] %s620_s19 }
  0x33   : > { %s606_s8 = sshll.u32 %s3858_s15, 4  ;;  %p67_p10 = scmp.ne.s32.totalorder %s3134_s25, %s3130_s2  ;;  %s607_s8 = int_to_ptr.hbm [resolvable:$true] %s606_s8 }
  0x34   : > { %2622 = dma.hbm_to_vmem [thread:$0]  (!%p3322_p6), %s621_s19, 256, %s623_s13, [#allocation12], %s3146_s5, %s3146_s5, %s3147_s21  }
  0x35   : > { %s635_s9 = sshll.u32 %s3859_s17, 4  ;;  %s646_s13 = sshll.u32 %s3860_s18, 4  ;;  %s636_s9 = int_to_ptr.hbm [resolvable:$true] %s635_s9  ;;  %s647_s13 = int_to_ptr.hbm [resolvable:$true] %s646_s13 }
  0x36   : > { %2619 = dma.hbm_to_vmem [thread:$0]  (!%p3322_p6), %s607_s8, 32, %s609_s22, [#allocation9], %s3148_s20, %s3148_s20, %s3149_s23  }
  0x37   : > { %s3152_s19 = smov [#allocation13]   ;;  %s648_s8 = sshll.u32 %s3153_s12, 4  ;;  %s649_s8 = int_to_ptr.vmem [resolvable:$true] %s648_s8 }
  0x38   : > { %s637_s21 = sshll.u32 %s3152_s19, 4  ;;  %s3154_s20 = smov 128   ;;  %s638_s21 = int_to_ptr.vmem [resolvable:$true] %s637_s21 }
  0x39   : > { %2625 = dma.hbm_to_vmem [thread:$0]  (!%p3322_p6), %s636_s9, 16, %s638_s21, [#allocation12]  }
  0x3a   : > { %2628 = dma.hbm_to_vmem [thread:$0]  (!%p3322_p6), %s647_s13, 512, %s649_s8, [#allocation15], %s3154_s20, %s3154_s20, %s3155_s29  }
  0x3b   : > { %s2353_s5 = sadd.s32 4294967294, %s3142_s27   ;;  %s3352_s23 = sadd.s32 1, %s3142_s27  }
  0x3c   : > { %s51_s1 = ssub.s32 %s3142_s27, %s3352_s23  ;;  %p3365_p11 = por %p62_p9, %p61_p8 }
  0x3d   : > { %p52_p7 = scmp.eq.s32.totalorder %s51_s1, 0  ;;  %p3371_p12 = por %p68_p1, %p67_p10 }
  0x3e   : > { %p495_p13 = scmp.eq.s32.totalorder %s3305_s4, 1  ;;  %p501_p0 = scmp.eq.s32.totalorder %s2353_s5, 1 }
  0x3f   : > { %s3363_s0 = scalar_select %p52_p7, %s3138_s26, %s54_s28  }
  0x40   : > { %p2649_p2 = scmp.lt.s32.totalorder %s3142_s27, 2  ;;  %s3378_s24 = sand.u32 1, %s3138_s26  }
  0x41   : > { %3861 = sst [smem:[#allocation28_spill]] %s3363_s0  ;;  %p3380_p4 = por %p495_p13, %p61_p8 }
  0x42   : > { %p3384_p6 = por %p501_p0, %p67_p10  ;;  %s2362_s11 = sshll.u32 %s3378_s24, 3 }
  0x43   : > { %s2363_s13 = sshll.u32 %s3142_s27, 3  ;;  %s3866_s12 = sld [smem:[#allocation29_spill]] }
  0x44   : > { %s669_s20 = scalar_lea.vmem [#allocation2], %s2362_s11  ;;  %p3395_p7 = pnand %p2649_p2, %p3365_p11 }
  0x45   : > { %s677_s29 = sshll.u32 %s669_s20, 4  ;;  %s684_s28 = sand.u32 1, %s3142_s27   ;;  %s678_s29 = int_to_ptr.vmem [resolvable:$true] %s677_s29 }
  0x46   : > { %s666_s15 = scalar_lea.sflag [#allocation3], %s3378_s24  ;;  %p2968_p9 = pneg %p3395_p7 }
  0x49   : > { %s673_s8 = scalar_lea.hbm %s3866_s12, %s2363_s13  ;;  %s2971_s13 = scalar_lea.hbm %s3866_s12, 16 }
  0x4a   : > { %s675_s5 = sshll.u32 %s673_s8, 4  ;;  %s676_s5 = int_to_ptr.hbm [resolvable:$true] %s675_s5 }
  0x4b   : > { %s2964_s16 = sshra.s32 %s676_s5, 4  ;;  %s2965_s16 = int_to_ptr.hbm [resolvable:$true] %s2964_s16 }
  0x4c   : > { %s2966_s17 = scalar_lea.hbm %s2965_s16, 8  ;;  %p2972_p11 = scmp.lt.s32.totalorder %s2965_s16, %s3866_s12 }
  0x4d   : > { %p2967_p8 = scmp.ne.s32.totalorder %s2965_s16, %s2966_s17  ;;  %p2973_p0 = scmp.lt.s32.totalorder %s2971_s13, %s2966_s17 }
  0x4f   : > { %p2969_p10 = pnand %p2968_p9, %p2967_p8  ;;  %p2974_p2 = por %p2973_p0, %p2972_p11 }
  0x51   : > { %p2970_p13 = pneg %p2969_p10 }
  0x53   : > { %p2975_p5 = pnand %p2974_p2, %p2970_p13 }
  0x55   : > { %2978 = shalt.err (!%p2975_p5)
}
  0x56   : > { %2632 = dma.hbm_to_vmem [thread:$0]  (!%p3395_p7), %s676_s5, 128, %s678_s29, %s666_s15  }
  0x57   : > { %s3868_s18 = sld [smem:[#allocation30_spill]]  ;;  %s687_s11 = scalar_lea.vmem [#allocation5], %s3378_s24 }
  0x58   : > { %s694_s22 = sshll.u32 %s687_s11, 4  ;;  %s685_s16 = scalar_lea.sflag [#allocation6], %s684_s28  ;;  %s695_s22 = int_to_ptr.vmem [resolvable:$true] %s694_s22 }
  0x5d   : > { %s690_s0 = scalar_lea.hbm %s3868_s18, %s3142_s27  ;;  %s3001_s29 = scalar_lea.hbm %s3868_s18, 2 }
  0x5e   : > { %s692_s26 = sshll.u32 %s690_s0, 4  ;;  %s693_s26 = int_to_ptr.hbm [resolvable:$true] %s692_s26 }
  0x5f   : > { %s2994_s17 = sshra.s32 %s693_s26, 4  ;;  %s2995_s17 = int_to_ptr.hbm [resolvable:$true] %s2994_s17 }
  0x60   : > { %s2996_s13 = scalar_lea.hbm %s2995_s17, 1  ;;  %p3002_p13 = scmp.lt.s32.totalorder %s2995_s17, %s3868_s18 }
  0x61   : > { %p2997_p5 = scmp.ne.s32.totalorder %s2995_s17, %s2996_s13  ;;  %p3003_p11 = scmp.lt.s32.totalorder %s3001_s29, %s2996_s13 }
  0x63   : > { %p2999_p8 = pnand %p2997_p5, %p2968_p9  ;;  %p3004_p0 = por %p3003_p11, %p3002_p13 }
  0x65   : > { %p3000_p10 = pneg %p2999_p8 }
  0x67   : > { %p3005_p2 = pnand %p3004_p0, %p3000_p10 }
  0x69   : > { %3008 = shalt.err (!%p3005_p2)
}
  0x6a   : > { %2635 = dma.hbm_to_vmem [thread:$0]  (!%p3395_p7), %s693_s26, 16, %s695_s22, %s685_s16  }
  0x6b   : > { %703 = sbr.rel (%p3310_p3) target bundleno = 5264 (0x1490), region = 100  ;;  %s3433_s0 = sand.u32 (!%p3310_p3), 1, %s3134_s25  }
  0x6c   : > { %s3823_s24 = sshll.u32 (!%p3310_p3), %s3433_s0, 3  ;;  %s706_s28 = scalar_lea.sflag (!%p3310_p3), [#allocation3], %s3433_s0 }
  0x6d   : > { %s709_s8 = scalar_lea.vmem (!%p3310_p3), [#allocation2], %s3823_s24 }
  0x70   : > { %3097 = dma.done.wait (%p3371_p12), %s706_s28, 128  }
  0x71   : > { %3099 = vsyncadd (%p3371_p12), %s706_s28, 4294967168  ;;  %s715_s26 = sand.u32 1, %s3305_s4   ;;  %s718_s1 = scalar_lea.vmem [#allocation5], %s3433_s0 }
  0x72   : > { %s716_s30 = scalar_lea.sflag [#allocation6], %s715_s26 }
  0x73   : > { %3101 = dma.done.wait (%p3371_p12), %s716_s30, 16  }
  0x74   : > { %3103 = vsyncadd (%p3371_p12), %s716_s30, 4294967280 }
  0x75   : > { %3105 = dma.done.wait (%p68_p1), [#allocation6], 128  }
  0x76   : > { %3107 = vsyncadd (%p68_p1), [#allocation6], 4294967168 }
  0x77   : > { %3109 = dma.done.wait (%p68_p1), [#allocation9], 64  }
  0x78   : > { %3111 = vsyncadd (%p68_p1), [#allocation9], 4294967232 }
  0x79   : > { %3113 = dma.done.wait (%p68_p1), [#allocation12], 272  }
  0x7a   : > { %3115 = vsyncadd (%p68_p1), [#allocation12], 4294967024 }
  0x7b   : > { %3117 = dma.done.wait (%p68_p1), [#allocation15], 512  }
  0x7c   : > { %3119 = vsyncadd (%p68_p1), [#allocation15], 4294966784  ;;  %v2549_v0 = vld [vmem:[#allocation7] sm:$0xff]  ;;  %v818_v1 = vld [vmem:[%s709_s8] sm:$0xff]  ;;  %s3869_s11 = sld [smem:[#allocation33_spill]]  ;;  %vm835_vm0 = vcmask 130048  }
  0x7d   : > { %v822_v3 = vpack.c.bf16 %v818_v1, %v818_v1  ;;  %846 = vmatpush.bf16.msra.mxu0 %v2549_v0  ;;  %s3870_s19 = sld [smem:[#allocation32_spill]]  ;;  %vm873_vm1 = vcmask 261120   ;;  %s3156_s21 = smov 88   ;;  %vm896_vm2 = vcmask 64512   ;;  %v819_v15 = vld [vmem:[%s718_s1] sm:$0x1] }
  0x7e   : > { %s3871_s5 = sld [smem:[#allocation34_spill]]  ;;  %s3157_s28 = smov 96   ;;  %v820_v16 = vsub.f32 1.0, %v819_v15 }
  0x7f   : > { %s3158_s8 = smov 120   ;;  %s3159_s26 = smov 80  }
  0x80   : > { %2377 = vmatmul.msk.bf16.vlgmr.msra.gmra.mxu0 %vm835_vm0, %v822_v3  ;;  %v821_v17 = vmul.f32 -1e+09, %v820_v16  ;;  %s3831_s30 = smov 112   ;;  %s3830_s3 = smov 104  }
  0x81   : > { %s3162_s1 = smov 64   ;;  %s3829_s20 = smov 56  }
  0x82   : > { %v2551_v2 = vld [vmem:[%s3869_s11 + $0x8] sm:$0xff]  ;;  %v2550_v4 = vld [vmem:[%s3869_s11] sm:$0xff]  ;;  %v3496_v18 = vperm.slane %v821_v17, 0  ;;  %s3164_s22 = smov 72   ;;  %s3824_s16 = smov 8  }
  0x83   : > { %883 = vmatpush.bf16.msra.mxu1 %v2551_v2  ;;  %v2716_v5 = vld [vmem:[%s3870_s19] ss:$0 sm:$0xff]  ;;  %s3828_s17 = smov 48   ;;  %s3825_s13 = smov 40  }
  0x84   : > { %v2717_v10 = vld [vmem:[%s3871_s5] ss:$0 sm:$0xff]  ;;  %s3827_s19 = smov 16   ;;  %s3826_s24 = smov 24  }
  0x85   : > { %s3887_s15 = sshll.u32 %s3433_s0, 3 }
  0x86   : > { %s809_s29 = scalar_lea.vmem [#allocation16], %s3887_s15 }
  0x87   : > { %884 = vmatpush.bf16.msra.mxu1 %v2550_v4 }
  0xfd   : > { %v848_v6 = vpop.f32.mrf.mxu0 }
  0xfe   : > { %v3475_v7 = vadd.f32 %v2716_v5, %v848_v6 }
 0x100   : > { %v852_v8 = vpack.c.bf16 %v3475_v7, %v3475_v7 }
 0x102   : > { %2386 = vmatmul.msk.bf16.vlgmr.msra.gmra.mxu1 %vm873_vm1, %v852_v8 }
 0x105   : > { %v850_v9 = vpop.f32.mrf.mxu0 }
 0x17f   : > { %v886_v11 = vpop.f32.mrf.mxu1 }
 0x180   : > { %v3483_v12 = vadd.f32 %v2717_v10, %v886_v11 }
 0x182   : > { %973 = vrot.lane.b32.xlu2 %v3483_v12, %s3156_s21  ;;  %894 = vrot.lane.b32.xlu0 %v3483_v12, %s3157_s28 }
 0x187   : > { %v888_v13 = vpop.f32.mrf.mxu1 }
 0x18a   : > { %971 = vrot.lane.b32.xlu2 %v3483_v12, %s3158_s8 }
 0x1dc   : > { %v974_v38 = vpop.permute.xlu2 %973 }
 0x1e4   : > { %v972_v42 = vpop.permute.xlu2 %971 }
 0x1f4   : > { %v895_v14 = vpop.permute.xlu0 %894 }
 0x1f5   : > { %2387 = vmatpush.xpose.msk.msra.mxu2 %vm896_vm2, %v895_v14 }
 0x1f8   : > { %2388 = vmatmul.msk.f32.vlgmr.msra.gmra.mxu2 %vm896_vm2, %v3483_v12 }
 0x27b   : > { %v918_v19 = vpop.f32.mrf.mxu2 }
 0x27c   : > { %v919_v20 = vadd.f32 %v918_v19, %v3496_v18 }
 0x27e   : > { %v921_v21 = vsel %vm896_vm2, %v919_v20, -inf }
 0x27f   : > { %922 = vmax.xlane.f32.xlu0 %v921_v21 }
 0x293   : > { %1051 = vrot.lane.b32.xlu0 %v3483_v12, %s3159_s26 }
 0x29b   : > { %1049 = vrot.lane.b32.xlu0 %v3483_v12, %s3831_s30  ;;  %s3875_s30 = sld [smem:[#allocation39_spill]] }
 0x2a3   : > { %1127 = vrot.lane.b32.xlu0 %v3483_v12, %s3830_s3  ;;  %s3884_s3 = smov 24  }
 0x2f2   : > { %v923_v22 = vpop.xlane.xlu0 %922 }
 0x2f3   : > { %v924_v23 = vsub.f32 %v919_v20, %v923_v22 }
 0x2f5   : > { %v925_v24 = vmul.f32 1.442695, %v924_v23 }
 0x2f7   : > { %2734 = vpow2.f32 %v925_v24 }
 0x2fd   : > { %v2735_v25 = vpop.eup %2734 }
 0x2fe   : > { %v927_v26 = vsel %vm896_vm2, %v2735_v25, 0.0 }
 0x2ff   : > { %928 = vadd.xlane.f32.xlu1 %v927_v26 }
 0x305   : > { %v1052_v41 = vpop.permute.xlu0 %1051 }
 0x30d   : > { %v1050_v43 = vpop.permute.xlu0 %1049 }
 0x315   : > { %v1128_v13 = vpop.permute.xlu0 %1127 }
 0x318   : > { %945 = vrot.lane.b32.xlu1 %v3483_v12, %s3162_s1 }
 0x372   : > { %v929_v27 = vpop.xlane.xlu1 %928 }
 0x373   : > { %2736 = vrcp.f32 %v929_v27  ;;  %v941_v33 = vand.u32 2147483648, %v929_v27  ;;  %vm935_vm4 = vweird.f32 %v929_v27  ;;  %v939_v34 = vand.u32 2147483647, %v929_v27 }
 0x375   : > { %v942_v36 = vor.u32 1.1754944e-38, %v941_v33  ;;  %vm940_vm6 = vcmp.eq.f32.partialorder %v939_v34, 8.507059e+37 }
 0x379   : > { %v2737_v28 = vpop.eup %2736 }
 0x37a   : > { %v931_v29 = vmul.f32 %v2737_v28, %v929_v27  ;;  %vm936_vm3 = vweird.f32 %v2737_v28 }
 0x37b   : > { %vm937_vm5 = vmor %vm935_vm4, %vm936_vm3 }
 0x37c   : > { %v932_v30 = vsub.f32 1.0, %v931_v29 }
 0x37e   : > { %v933_v31 = vmul.f32 %v2737_v28, %v932_v30 }
 0x380   : > { %v934_v32 = vadd.f32 %v2737_v28, %v933_v31 }
 0x382   : > { %v938_v35 = vsel %vm937_vm5, %v2737_v28, %v934_v32 }
 0x383   : > { %v943_v37 = vsel %vm940_vm6, %v942_v36, %v938_v35  ;;  %vm1219_vm6 = vcmask 195584  }
 0x384   : > { %v944_v40 = vmul.f32 %v2735_v25, %v943_v37 }
 0x38a   : > { %v946_v39 = vpop.permute.xlu1 %945 }
 0x38b   : > { %966 = vmatpush.msra.mxu3 %v946_v39 }
 0x38c   : > { %2389 = vmatmul.msk.f32.vlgmr.msra.gmra.mxu3 %vm896_vm2, %v944_v40 }
 0x38d   : > { %2390 = vmatpush.xpose.msk.msrb.mxu3 %vm896_vm2, %v974_v38 }
 0x391   : > { %2393 = vmatpush.xpose.msk.msra.mxu3 %vm896_vm2, %v1052_v41 }
 0x394   : > { %2391 = vmatmul.msk.f32.vlgmr.msrb.gmra.mxu3 %vm896_vm2, %v972_v42 }
 0x39c   : > { %2394 = vmatmul.msk.f32.vlgmr.msra.gmra.mxu3 %vm896_vm2, %v1050_v43 }
 0x40f   : > { %v3514_v44 = vpop.f32.mrf.mxu3 }
 0x417   : > { %v996_v45 = vpop.f32.mrf.mxu3 }
 0x418   : > { %v997_v46 = vadd.f32 %v996_v45, %v3496_v18 }
 0x41a   : > { %v999_v47 = vsel %vm896_vm2, %v997_v46, -inf }
 0x41b   : > { %1000 = vmax.xlane.f32.xlu2 %v999_v47 }
 0x41f   : > { %v1074_v48 = vpop.f32.mrf.mxu3 }
 0x420   : > { %v1075_v49 = vadd.f32 %v1074_v48, %v3496_v18 }
 0x422   : > { %v1077_v50 = vsel %vm896_vm2, %v1075_v49, -inf }
 0x433   : > { %1023 = vrot.lane.b32.xlu2 %v3483_v12, %s3829_s20 }
 0x45c   : > { %1078 = vmax.xlane.f32.xlu2 %v1077_v50 }
 0x48e   : > { %v1001_v51 = vpop.xlane.xlu2 %1000 }
 0x48f   : > { %v1002_v52 = vsub.f32 %v997_v46, %v1001_v51  ;;  %v2553_v51 = vld [vmem:[%s3795_s6 + $0x8] sm:$0xff] }
 0x491   : > { %v1003_v53 = vmul.f32 1.442695, %v1002_v52 }
 0x493   : > { %2738 = vpow2.f32 %v1003_v53  ;;  %v2552_v53 = vld [vmem:[%s3795_s6] sm:$0xff] }
 0x496   : > { %v1024_v54 = vpop.permute.xlu2 %1023 }
 0x497   : > { %1044 = vmatpush.msrb.mxu2 %v1024_v54 }
 0x499   : > { %v2739_v55 = vpop.eup %2738 }
 0x49a   : > { %v1005_v56 = vsel %vm896_vm2, %v2739_v55, 0.0 }
 0x49b   : > { %1006 = vadd.xlane.f32.xlu1 %v1005_v56 }
 0x4b4   : > { %1129 = vrot.lane.b32.xlu1 %v3483_v12, %s3164_s22 }
 0x4cf   : > { %v1079_v57 = vpop.xlane.xlu2 %1078 }
 0x4d0   : > { %v1080_v58 = vsub.f32 %v1075_v49, %v1079_v57 }
 0x4d2   : > { %v1081_v59 = vmul.f32 1.442695, %v1080_v58 }
 0x4d4   : > { %2740 = vpow2.f32 %v1081_v59 }
 0x4da   : > { %v2741_v60 = vpop.eup %2740 }
 0x4db   : > { %v1083_v61 = vsel %vm896_vm2, %v2741_v60, 0.0 }
 0x4de   : > { %1084 = vadd.xlane.f32.xlu1 %v1083_v61  ;;  %v2718_v61 = vld [vmem:[%s3796_s7] ss:$0 sm:$0xff] }
 0x50e   : > { %v1007_v62 = vpop.xlane.xlu1 %1006 }
 0x50f   : > { %2742 = vrcp.f32 %v1007_v62  ;;  %v1019_v2 = vand.u32 2147483648, %v1007_v62  ;;  %v1017_v4 = vand.u32 2147483647, %v1007_v62  ;;  %vm1013_vm8 = vweird.f32 %v1007_v62 }
 0x511   : > { %v1020_v6 = vor.u32 1.1754944e-38, %v1019_v2  ;;  %vm1018_vm10 = vcmp.eq.f32.partialorder %v1017_v4, 8.507059e+37  ;;  %v3170_v2 = vmov 32.0  }
 0x515   : > { %v2743_v63 = vpop.eup %2742 }
 0x516   : > { %v1009_v0 = vmul.f32 %v2743_v63, %v1007_v62  ;;  %vm1014_vm7 = vweird.f32 %v2743_v63 }
 0x517   : > { %vm1015_vm9 = vmor %vm1013_vm8, %vm1014_vm7 }
 0x518   : > { %v1010_v1 = vsub.f32 1.0, %v1009_v0 }
 0x51a   : > { %v1011_v3 = vmul.f32 %v2743_v63, %v1010_v1 }
 0x51c   : > { %v1012_v5 = vadd.f32 %v2743_v63, %v1011_v3 }
 0x51e   : > { %v1016_v8 = vsel %vm1015_vm9, %v2743_v63, %v1012_v5 }
 0x51f   : > { %v1021_v9 = vsel %vm1018_vm10, %v1020_v6, %v1016_v8 }
 0x520   : > { %v1022_v10 = vmul.f32 %v2739_v55, %v1021_v9 }
 0x522   : > { %2392 = vmatmul.msk.f32.vlgmr.msrb.gmra.mxu2 %vm896_vm2, %v1022_v10 }
 0x526   : > { %v1130_v11 = vpop.permute.xlu1 %1129 }
 0x527   : > { %2396 = vmatpush.xpose.msk.msra.mxu2 %vm896_vm2, %v1130_v11 }
 0x52a   : > { %2397 = vmatmul.msk.f32.vlgmr.msra.gmra.mxu2 %vm896_vm2, %v1128_v13 }
 0x551   : > { %v1085_v19 = vpop.xlane.xlu1 %1084 }
 0x552   : > { %2744 = vrcp.f32 %v1085_v19  ;;  %v1097_v28 = vand.u32 2147483648, %v1085_v19  ;;  %vm1091_vm12 = vweird.f32 %v1085_v19  ;;  %v1095_v30 = vand.u32 2147483647, %v1085_v19 }
 0x554   : > { %v1098_v33 = vor.u32 1.1754944e-38, %v1097_v28  ;;  %vm1096_vm14 = vcmp.eq.f32.partialorder %v1095_v30, 8.507059e+37 }
 0x558   : > { %v2745_v20 = vpop.eup %2744 }
 0x559   : > { %v1087_v21 = vmul.f32 %v2745_v20, %v1085_v19  ;;  %vm1092_vm11 = vweird.f32 %v2745_v20 }
 0x55a   : > { %vm1093_vm13 = vmor %vm1091_vm12, %vm1092_vm11  ;;  %vm1373_vm11 = vcmask 523264  }
 0x55b   : > { %v1088_v23 = vsub.f32 1.0, %v1087_v21 }
 0x55d   : > { %v1089_v26 = vmul.f32 %v2745_v20, %v1088_v23 }
 0x55f   : > { %v1090_v27 = vadd.f32 %v2745_v20, %v1089_v26 }
 0x561   : > { %v1094_v32 = vsel %vm1093_vm13, %v2745_v20, %v1090_v27 }
 0x562   : > { %v1099_v34 = vsel %vm1096_vm14, %v1098_v33, %v1094_v32  ;;  %v2720_v32 = vld [vmem:[#allocation8] ss:$0 sm:$0xff] }
 0x563   : > { %v1100_v36 = vmul.f32 %v2741_v60, %v1099_v34 }
 0x5a5   : > { %v1046_v14 = vpop.f32.mrf.mxu2 }
 0x5a6   : > { %1206 = vrot.lane.b32.xlu1 %v1046_v14, %s3824_s16  ;;  %s3873_s16 = sld [smem:[#allocation35_spill]] }
 0x5ad   : > { %v1152_v15 = vpop.f32.mrf.mxu2 }
 0x5ae   : > { %v1153_v16 = vadd.f32 %v1152_v15, %v3496_v18  ;;  %v2555_v15 = vld [vmem:[%s3799_s10 + $0x8] sm:$0xff] }
 0x5af   : > { %1328 = vmatpush.bf16.msrb.mxu0 %v2555_v15 }
 0x5b0   : > { %v1155_v17 = vsel %vm896_vm2, %v1153_v16, -inf }
 0x5b1   : > { %1156 = vmax.xlane.f32.xlu0 %v1155_v17 }
 0x5c5   : > { %1101 = vrot.lane.b32.xlu0 %v3483_v12, %s3828_s17  ;;  %s3872_s17 = sld [smem:[#allocation38_spill]] }
 0x5cb   : > { %v2559_v17 = vld [vmem:[%s3872_s17 + $0x18] sm:$0xff]  ;;  %v2558_v21 = vld [vmem:[%s3872_s17 + $0x10] sm:$0xff] }
 0x5cc   : > { %1381 = vmatpush.bf16.msrb.mxu2 %v2559_v17 }
 0x5d0   : > { %1382 = vmatpush.bf16.msrb.mxu2 %v2558_v21 }
 0x618   : > { %v1207_v54 = vpop.permute.xlu1 %1206 }
 0x619   : > { %v1217_v56 = vsel %vm896_vm2, %v3514_v44, %v1207_v54 }
 0x624   : > { %v1157_v22 = vpop.xlane.xlu0 %1156 }
 0x625   : > { %v1158_v24 = vsub.f32 %v1153_v16, %v1157_v22  ;;  %v2554_v16 = vld [vmem:[%s3799_s10] sm:$0xff] }
 0x626   : > { %1329 = vmatpush.bf16.msrb.mxu0 %v2554_v16 }
 0x627   : > { %v1159_v25 = vmul.f32 1.442695, %v1158_v24 }
 0x629   : > { %2746 = vpow2.f32 %v1159_v25 }
 0x62f   : > { %v2747_v29 = vpop.eup %2746 }
 0x630   : > { %v1161_v31 = vsel %vm896_vm2, %v2747_v29, 0.0 }
 0x631   : > { %1162 = vadd.xlane.f32.xlu2 %v1161_v31 }
 0x637   : > { %v1102_v35 = vpop.permute.xlu0 %1101 }
 0x638   : > { %1122 = vmatpush.msrb.mxu3 %v1102_v35 }
 0x639   : > { %2395 = vmatmul.msk.f32.vlgmr.msrb.gmra.mxu3 %vm896_vm2, %v1100_v36  ;;  %v2557_v36 = vld [vmem:[%s3872_s17 + $0x8] sm:$0xff] }
 0x63a   : > { %1251 = vmatpush.bf16.msra.mxu3 %v2553_v51  ;;  %1383 = vmatpush.bf16.msrb.mxu2 %v2557_v36 }
 0x63e   : > { %1252 = vmatpush.bf16.msra.mxu3 %v2552_v53 }
 0x649   : > { %1179 = vrot.lane.b32.xlu2 %v3483_v12, %s3825_s13  ;;  %s3876_s13 = sld [smem:[#allocation40_spill]] }
 0x6a4   : > { %v1163_v37 = vpop.xlane.xlu2 %1162 }
 0x6a5   : > { %2748 = vrcp.f32 %v1163_v37  ;;  %v1175_v42 = vand.u32 2147483648, %v1163_v37  ;;  %v1173_v45 = vand.u32 2147483647, %v1163_v37  ;;  %vm1169_vm3 = vweird.f32 %v1163_v37 }
 0x6a6   : > { %2750 = vrcp.f32 %v3170_v2 }
 0x6a7   : > { %v1176_v47 = vor.u32 1.1754944e-38, %v1175_v42  ;;  %vm1174_vm5 = vcmp.eq.f32.partialorder %v1173_v45, 8.507059e+37  ;;  %v2722_v45 = vld [vmem:[%s3875_s30] ss:$0 sm:$0xff] }
 0x6ab   : > { %v2749_v38 = vpop.eup %2748 }
 0x6ac   : > { %v1165_v39 = vmul.f32 %v2749_v38, %v1163_v37  ;;  %v1180_v40 = vpop.permute.xlu2 %1179  ;;  %vm1170_vm15 = vweird.f32 %v2749_v38  ;;  %v2751_v3 = vpop.eup %2750  ;;  %v2556_v37 = vld [vmem:[%s3872_s17] sm:$0xff] }
 0x6ad   : > { %1200 = vmatpush.msrb.mxu1 %v1180_v40  ;;  %vm1171_vm4 = vmor %vm1169_vm3, %vm1170_vm15  ;;  %v1265_v4 = vmul.f32 32.0, %v2751_v3  ;;  %vm1269_vm7 = vweird.f32 %v2751_v3  ;;  %1384 = vmatpush.bf16.msrb.mxu2 %v2556_v37 }
 0x6ae   : > { %v1166_v41 = vsub.f32 1.0, %v1165_v39 }
 0x6af   : > { %v1266_v5 = vsub.f32 1.0, %v1265_v4 }
 0x6b0   : > { %v1167_v43 = vmul.f32 %v2749_v38, %v1166_v41 }
 0x6b1   : > { %v1267_v6 = vmul.f32 %v2751_v3, %v1266_v5 }
 0x6b2   : > { %v1168_v46 = vadd.f32 %v2749_v38, %v1167_v43 }
 0x6b3   : > { %v1268_v8 = vadd.f32 %v2751_v3, %v1267_v6 }
 0x6b4   : > { %v1172_v48 = vsel %vm1171_vm4, %v2749_v38, %v1168_v46 }
 0x6b5   : > { %v1177_v49 = vsel %vm1174_vm5, %v1176_v47, %v1172_v48  ;;  %v3557_v9 = vsel %vm1269_vm7, %v2751_v3, %v1268_v8  ;;  %v2724_v3 = vld [vmem:[#allocation10] ss:$0 sm:$0xff] }
 0x6b6   : > { %v1178_v50 = vmul.f32 %v2747_v29, %v1177_v49  ;;  %v2719_v29 = vld [vmem:[%s3873_s16] ss:$0 sm:$0xff] }
 0x6b8   : > { %2398 = vmatmul.msk.f32.vlgmr.msrb.gmra.mxu1 %vm896_vm2, %v1178_v50 }
 0x6bc   : > { %v1124_v12 = vpop.f32.mrf.mxu3 }
 0x6bd   : > { %1210 = vrot.lane.b32.xlu0 %v1124_v12, %s3827_s19  ;;  %s3874_s19 = sld [smem:[#allocation37_spill]] }
 0x6c3   : > { %v2721_v38 = vld [vmem:[%s3874_s19] ss:$0 sm:$0xff] }
 0x72f   : > { %v1211_v55 = vpop.permute.xlu0 %1210 }
 0x730   : > { %v1218_v57 = vsel %vm835_vm0, %v1217_v56, %v1211_v55  ;;  %v2561_v55 = vld [vmem:[%s3869_s11 + $0x18] sm:$0xff]  ;;  %v2560_v56 = vld [vmem:[%s3869_s11 + $0x10] sm:$0xff] }
 0x731   : > { %1455 = vmatpush.bf16.msra.mxu1 %v2561_v55 }
 0x735   : > { %v1202_v52 = vpop.f32.mrf.mxu1  ;;  %1456 = vmatpush.bf16.msra.mxu1 %v2560_v56 }
 0x736   : > { %1214 = vrot.lane.b32.xlu2 %v1202_v52, %s3826_s24  ;;  %s3883_s24 = smov 16  }
 0x790   : > { %v1215_v58 = vpop.permute.xlu2 %1214 }
 0x791   : > { %v1220_v59 = vsel %vm1219_vm6, %v1218_v57, %v1215_v58 }
 0x792   : > { %v1221_v60 = vpack.c.bf16 %v1220_v59, %v1220_v59 }
 0x794   : > { %2407 = vmatmul.msk.bf16.vlgmr.msra.gmra.mxu3 %vm873_vm1, %v1221_v60 }
 0x817   : > { %v1254_v62 = vpop.f32.mrf.mxu3 }
 0x818   : > { %v1255_v63 = vadd.f32 %v2718_v61, %v1254_v62 }
 0x81a   : > { %v1258_v0 = vadd.f32 %v1255_v63, %v3475_v7 }
 0x81c   : > { %v1261_v1 = vsel %vm873_vm1, %v1258_v0, 0.0 }
 0x81d   : > { %1262 = vadd.xlane.f32.xlu0 %v1261_v1 }
 0x81f   : > { %v1256_v44 = vpop.f32.mrf.mxu3 }
 0x820   : > { %v2723_v44 = vld [vmem:[%s3876_s13] ss:$0 sm:$0xff] }
 0x890   : > { %v1263_v10 = vpop.xlane.xlu0 %1262 }
 0x891   : > { %v1271_v11 = vmul.f32 %v3557_v9, %v1263_v10  ;;  %v2725_v10 = vld [vmem:[%s3871_s5 + $0x1] ss:$0 sm:$0xff] }
 0x893   : > { %v1272_v13 = vsub.f32 %v1258_v0, %v1271_v11 }
 0x895   : > { %v1273_v14 = vmul.f32 %v1272_v13, %v1272_v13 }
 0x897   : > { %v1274_v7 = vsel %vm873_vm1, %v1273_v14, 0.0 }
 0x898   : > { %1275 = vadd.xlane.f32.xlu2 %v1274_v7 }
 0x90b   : > { %v1276_v19 = vpop.xlane.xlu2 %1275 }
 0x90c   : > { %v1277_v20 = vmul.f32 %v1276_v19, %v3557_v9 }
 0x90e   : > { %v1278_v22 = vadd.f32 1e-05, %v1277_v20 }
 0x910   : > { %2752 = vrsqrt.f32 %v1278_v22  ;;  %vm1285_vm9 = vweird.f32 %v1278_v22 }
 0x916   : > { %v2753_v23 = vpop.eup %2752 }
 0x917   : > { %v1280_v24 = vmul.f32 %v2753_v23, %v1278_v22  ;;  %vm1286_vm8 = vweird.f32 %v2753_v23 }
 0x918   : > { %vm1287_vm10 = vmor %vm1285_vm9, %vm1286_vm8 }
 0x919   : > { %v1281_v25 = vmul.f32 %v2753_v23, %v1280_v24 }
 0x91b   : > { %v1282_v26 = vmul.f32 0.5, %v1281_v25 }
 0x91d   : > { %v1283_v27 = vsub.f32 1.5, %v1282_v26 }
 0x91f   : > { %v1284_v28 = vmul.f32 %v2753_v23, %v1283_v27 }
 0x921   : > { %v1288_v30 = vsel %vm1287_vm10, %v2753_v23, %v1284_v28 }
 0x922   : > { %v1289_v31 = vmul.f32 %v1288_v30, %v1272_v13 }
 0x924   : > { %v1293_v33 = vmul.f32 %v2719_v29, %v1289_v31 }
 0x926   : > { %v1297_v34 = vadd.f32 %v2720_v32, %v1293_v33 }
 0x928   : > { %v1298_v35 = vpack.c.bf16 %v1297_v34, %v1297_v34 }
 0x92a   : > { %2416 = vmatmul.msk.bf16.vlgmr.msrb.gmra.mxu0 %vm873_vm1, %v1298_v35 }
 0x9a7   : > { %v1331_v39 = vpop.f32.mrf.mxu0 }
 0x9a8   : > { %v1332_v40 = vadd.f32 %v2721_v38, %v1331_v39 }
 0x9aa   : > { %v1335_v41 = vmax.f32 %v1332_v40, 0.0 }
 0x9ac   : > { %v1336_v42 = vpack.c.bf16 %v1335_v41, %v1335_v41 }
 0x9ae   : > { %2433 = vmatmul.msk.bf16.vlgmr.msrb.gmra.mxu2 %vm1373_vm11, %v1336_v42 }
 0x9af   : > { %v1333_v43 = vpop.f32.mrf.mxu0 }
 0xa31   : > { %v1386_v46 = vpop.f32.mrf.mxu2 }
 0xa32   : > { %v1387_v47 = vadd.f32 %v2722_v45, %v1386_v46 }
 0xa34   : > { %v1390_v48 = vadd.f32 %v1387_v47, %v1297_v34 }
 0xa36   : > { %v1393_v49 = vsel %vm873_vm1, %v1390_v48, 0.0 }
 0xa37   : > { %1394 = vadd.xlane.f32.xlu1 %v1393_v49 }
 0xa39   : > { %v1388_v50 = vpop.f32.mrf.mxu2 }
 0xaaa   : > { %v1395_v12 = vpop.xlane.xlu1 %1394 }
 0xaab   : > { %v1396_v51 = vmul.f32 %v1395_v12, %v3557_v9 }
 0xaad   : > { %v1397_v52 = vsub.f32 %v1390_v48, %v1396_v51 }
 0xaaf   : > { %v1398_v53 = vmul.f32 %v1397_v52, %v1397_v52 }
 0xab1   : > { %v1399_v54 = vsel %vm873_vm1, %v1398_v53, 0.0 }
 0xab2   : > { %1400 = vadd.xlane.f32.xlu0 %v1399_v54 }
 0xb25   : > { %v1401_v57 = vpop.xlane.xlu0 %1400 }
 0xb26   : > { %v1402_v58 = vmul.f32 %v1401_v57, %v3557_v9 }
 0xb28   : > { %v1403_v59 = vadd.f32 1e-05, %v1402_v58 }
 0xb2a   : > { %2754 = vrsqrt.f32 %v1403_v59  ;;  %vm1410_vm13 = vweird.f32 %v1403_v59 }
 0xb30   : > { %v2755_v60 = vpop.eup %2754 }
 0xb31   : > { %v1405_v61 = vmul.f32 %v2755_v60, %v1403_v59  ;;  %vm1411_vm12 = vweird.f32 %v2755_v60 }
 0xb32   : > { %vm1412_vm14 = vmor %vm1410_vm13, %vm1411_vm12 }
 0xb33   : > { %v1406_v62 = vmul.f32 %v2755_v60, %v1405_v61 }
 0xb35   : > { %v1407_v63 = vmul.f32 0.5, %v1406_v62 }
 0xb37   : > { %v1408_v0 = vsub.f32 1.5, %v1407_v63 }
 0xb39   : > { %v1409_v1 = vmul.f32 %v2755_v60, %v1408_v0 }
 0xb3b   : > { %v1413_v2 = vsel %vm1412_vm14, %v2755_v60, %v1409_v1 }
 0xb3c   : > { %v1414_v4 = vmul.f32 %v1413_v2, %v1397_v52 }
 0xb3e   : > { %v1418_v5 = vmul.f32 %v2723_v44, %v1414_v4 }
 0xb40   : > { %v3604_v6 = vadd.f32 %v2724_v3, %v1418_v5 }
 0xb42   : > { %v1423_v8 = vpack.c.bf16 %v3604_v6, %v3604_v6 }
 0xb44   : > { %2447 = vmatmul.msk.bf16.vlgmr.msra.gmra.mxu1 %vm873_vm1, %v1423_v8 }
 0xbc1   : > { %v1458_v11 = vpop.f32.mrf.mxu1 }
 0xbc2   : > { %v3612_v13 = vadd.f32 %v2725_v10, %v1458_v11 }
 0xbc4   : > { %1513 = vrot.lane.b32.xlu1 %v3612_v13, %s3162_s1  ;;  %1463 = vrot.lane.b32.xlu2 %v3612_v13, %s3157_s28  ;;  %s3877_s28 = smov 112   ;;  %s3881_s1 = smov 40  }
 0xbc9   : > { %v1460_v14 = vpop.f32.mrf.mxu1 }
 0xbcc   : > { %1539 = vrot.lane.b32.xlu2 %v3612_v13, %s3158_s8  ;;  %s3879_s8 = smov 56  }
 0xbd4   : > { %1697 = vrot.lane.b32.xlu2 %v3612_v13, %s3164_s22  ;;  %s3882_s22 = smov 8  }
 0xc1e   : > { %v1464_v7 = vpop.permute.xlu2 %1463 }
 0xc1f   : > { %2448 = vmatpush.xpose.msk.msrb.mxu3 %vm896_vm2, %v1464_v7 }
 0xc22   : > { %2449 = vmatmul.msk.f32.vlgmr.msrb.gmra.mxu3 %vm896_vm2, %v3612_v13 }
 0xc26   : > { %v1540_v23 = vpop.permute.xlu2 %1539 }
 0xc2e   : > { %v1698_v27 = vpop.permute.xlu2 %1697 }
 0xc36   : > { %v1514_v15 = vpop.permute.xlu1 %1513 }
 0xc37   : > { %1534 = vmatpush.msra.mxu0 %v1514_v15 }
 0xca5   : > { %v1486_v16 = vpop.f32.mrf.mxu3 }
 0xca6   : > { %v1487_v17 = vadd.f32 %v1486_v16, %v3496_v18 }
 0xca8   : > { %v1489_v19 = vsel %vm896_vm2, %v1487_v17, -inf }
 0xca9   : > { %1490 = vmax.xlane.f32.xlu0 %v1489_v19 }
 0xcbd   : > { %1541 = vrot.lane.b32.xlu0 %v3612_v13, %s3156_s21  ;;  %s3878_s21 = smov 104  }
 0xcc5   : > { %1619 = vrot.lane.b32.xlu0 %v3612_v13, %s3159_s26  ;;  %s3880_s26 = smov 48  }
 0xccd   : > { %1617 = vrot.lane.b32.xlu0 %v3612_v13, %s3877_s28  ;;  %s2157_s28 = sshll.u32 %s809_s29, 4  ;;  %s2158_s28 = int_to_ptr.vmem [resolvable:$true] %s2157_s28 }
 0xd1c   : > { %v1491_v20 = vpop.xlane.xlu0 %1490 }
 0xd1d   : > { %v1492_v21 = vsub.f32 %v1487_v17, %v1491_v20 }
 0xd1f   : > { %v1493_v22 = vmul.f32 1.442695, %v1492_v21 }
 0xd21   : > { %2756 = vpow2.f32 %v1493_v22 }
 0xd27   : > { %v2757_v24 = vpop.eup %2756 }
 0xd28   : > { %v1495_v25 = vsel %vm896_vm2, %v2757_v24, 0.0 }
 0xd29   : > { %1496 = vadd.xlane.f32.xlu1 %v1495_v25 }
 0xd2f   : > { %v1542_v26 = vpop.permute.xlu0 %1541 }
 0xd30   : > { %2451 = vmatpush.xpose.msk.msrb.mxu1 %vm896_vm2, %v1542_v26 }
 0xd33   : > { %2452 = vmatmul.msk.f32.vlgmr.msrb.gmra.mxu1 %vm896_vm2, %v1540_v23 }
 0xd34   : > { %2457 = vmatpush.xpose.msk.msra.mxu1 %vm896_vm2, %v1698_v27 }
 0xd37   : > { %v1620_v28 = vpop.permute.xlu0 %1619 }
 0xd38   : > { %2454 = vmatpush.xpose.msk.msrb.mxu0 %vm896_vm2, %v1620_v28 }
 0xd3f   : > { %v1618_v46 = vpop.permute.xlu0 %1617 }
 0xd42   : > { %1695 = vrot.lane.b32.xlu1 %v3612_v13, %s3878_s21  ;;  %s2140_s21 = scalar_lea.sflag [#allocation4], %s3433_s0 }
 0xd9c   : > { %v1497_v29 = vpop.xlane.xlu1 %1496 }
 0xd9d   : > { %2758 = vrcp.f32 %v1497_v29  ;;  %v1509_v33 = vand.u32 2147483648, %v1497_v29  ;;  %v1507_v35 = vand.u32 2147483647, %v1497_v29  ;;  %vm1503_vm3 = vweird.f32 %v1497_v29 }
 0xd9f   : > { %v1510_v37 = vor.u32 1.1754944e-38, %v1509_v33  ;;  %vm1508_vm5 = vcmp.eq.f32.partialorder %v1507_v35, 8.507059e+37 }
 0xda3   : > { %v2759_v30 = vpop.eup %2758 }
 0xda4   : > { %v1499_v31 = vmul.f32 %v2759_v30, %v1497_v29  ;;  %vm1504_vm15 = vweird.f32 %v2759_v30 }
 0xda5   : > { %vm1505_vm4 = vmor %vm1503_vm3, %vm1504_vm15 }
 0xda6   : > { %v1500_v32 = vsub.f32 1.0, %v1499_v31 }
 0xda8   : > { %v1501_v34 = vmul.f32 %v2759_v30, %v1500_v32 }
 0xdaa   : > { %v1502_v36 = vadd.f32 %v2759_v30, %v1501_v34 }
 0xdac   : > { %v1506_v38 = vsel %vm1505_vm4, %v2759_v30, %v1502_v36 }
 0xdad   : > { %v1511_v39 = vsel %vm1508_vm5, %v1510_v37, %v1506_v38 }
 0xdae   : > { %v1512_v40 = vmul.f32 %v2757_v24, %v1511_v39 }
 0xdb0   : > { %2450 = vmatmul.msk.f32.vlgmr.msra.gmra.mxu0 %vm896_vm2, %v1512_v40  ;;  %v1564_v41 = vpop.f32.mrf.mxu1 }
 0xdb1   : > { %v1565_v42 = vadd.f32 %v1564_v41, %v3496_v18 }
 0xdb3   : > { %v1567_v43 = vsel %vm896_vm2, %v1565_v42, -inf }
 0xdb4   : > { %v1696_v45 = vpop.permute.xlu1 %1695  ;;  %1568 = vmax.xlane.f32.xlu2 %v1567_v43 }
 0xdb5   : > { %2458 = vmatmul.msk.f32.vlgmr.msra.gmra.mxu1 %vm896_vm2, %v1696_v45 }
 0xdb8   : > { %2455 = vmatmul.msk.f32.vlgmr.msrb.gmra.mxu0 %vm896_vm2, %v1618_v46 }
 0xe27   : > { %v1569_v47 = vpop.xlane.xlu2 %1568 }
 0xe28   : > { %v1570_v48 = vsub.f32 %v1565_v42, %v1569_v47 }
 0xe2a   : > { %v1571_v49 = vmul.f32 1.442695, %v1570_v48 }
 0xe2c   : > { %2760 = vpow2.f32 %v1571_v49  ;;  %v2563_v49 = vld [vmem:[%s3795_s6 + $0x18] sm:$0xff] }
 0xe2d   : > { %v3645_v50 = vpop.f32.mrf.mxu0  ;;  %1820 = vmatpush.bf16.msra.mxu0 %v2563_v49 }
 0xe32   : > { %v2761_v12 = vpop.eup %2760  ;;  %v1720_v51 = vpop.f32.mrf.mxu1 }
 0xe33   : > { %v1721_v52 = vadd.f32 %v1720_v51, %v3496_v18  ;;  %v1573_v53 = vsel %vm896_vm2, %v2761_v12, 0.0 }
 0xe34   : > { %1574 = vadd.xlane.f32.xlu2 %v1573_v53 }
 0xe35   : > { %v1642_v54 = vpop.f32.mrf.mxu0  ;;  %v1723_v55 = vsel %vm896_vm2, %v1721_v52, -inf }
 0xe36   : > { %v1643_v56 = vadd.f32 %v1642_v54, %v3496_v18  ;;  %1724 = vmax.xlane.f32.xlu1 %v1723_v55 }
 0xe38   : > { %v1645_v57 = vsel %vm896_vm2, %v1643_v56, -inf }
 0xe39   : > { %1646 = vmax.xlane.f32.xlu0 %v1645_v57 }
 0xe4c   : > { %1591 = vrot.lane.b32.xlu2 %v3612_v13, %s3879_s8 }
 0xea7   : > { %v1575_v58 = vpop.xlane.xlu2 %1574 }
 0xea8   : > { %2762 = vrcp.f32 %v1575_v58  ;;  %v1587_v3 = vand.u32 2147483648, %v1575_v58  ;;  %v1585_v5 = vand.u32 2147483647, %v1575_v58  ;;  %vm1581_vm8 = vweird.f32 %v1575_v58 }
 0xea9   : > { %v1725_v59 = vpop.xlane.xlu1 %1724 }
 0xeaa   : > { %v1726_v60 = vsub.f32 %v1721_v52, %v1725_v59  ;;  %v1588_v14 = vor.u32 1.1754944e-38, %v1587_v3  ;;  %vm1586_vm10 = vcmp.eq.f32.partialorder %v1585_v5, 8.507059e+37  ;;  %v2569_v3 = vld [vmem:[%s3872_s17 + $0x38] sm:$0xff] }
 0xeab   : > { %1948 = vmatpush.bf16.msrb.mxu1 %v2569_v3 }
 0xeac   : > { %v1727_v61 = vmul.f32 1.442695, %v1726_v60  ;;  %v1647_v62 = vpop.xlane.xlu0 %1646 }
 0xead   : > { %v1648_v63 = vsub.f32 %v1643_v56, %v1647_v62 }
 0xeae   : > { %v2763_v0 = vpop.eup %2762  ;;  %2764 = vpow2.f32 %v1727_v61 }
 0xeaf   : > { %v1577_v1 = vmul.f32 %v2763_v0, %v1575_v58  ;;  %v1649_v44 = vmul.f32 1.442695, %v1648_v63  ;;  %v1592_v2 = vpop.permute.xlu2 %1591  ;;  %vm1582_vm7 = vweird.f32 %v2763_v0  ;;  %v2726_v58 = vld [vmem:[%s3796_s7 + $0x1] ss:$0 sm:$0xff] }
 0xeb0   : > { %1612 = vmatpush.msra.mxu3 %v1592_v2  ;;  %vm1583_vm9 = vmor %vm1581_vm8, %vm1582_vm7 }
 0xeb1   : > { %v1578_v18 = vsub.f32 1.0, %v1577_v1  ;;  %2766 = vpow2.f32 %v1649_v44 }
 0xeb3   : > { %v1579_v4 = vmul.f32 %v2763_v0, %v1578_v18  ;;  %v2565_v18 = vld [vmem:[%s3799_s10 + $0x18] sm:$0xff] }
 0xeb4   : > { %v2765_v8 = vpop.eup %2764 }
 0xeb5   : > { %v1580_v10 = vadd.f32 %v2763_v0, %v1579_v4  ;;  %v1729_v11 = vsel %vm896_vm2, %v2765_v8, 0.0 }
 0xeb6   : > { %1730 = vadd.xlane.f32.xlu1 %v1729_v11 }
 0xeb7   : > { %v2767_v7 = vpop.eup %2766  ;;  %v1584_v15 = vsel %vm1583_vm9, %v2763_v0, %v1580_v10 }
 0xeb8   : > { %v1589_v16 = vsel %vm1586_vm10, %v1588_v14, %v1584_v15  ;;  %v1651_v17 = vsel %vm896_vm2, %v2767_v7, 0.0 }
 0xeb9   : > { %1652 = vadd.xlane.f32.xlu0 %v1651_v17  ;;  %v1590_v19 = vmul.f32 %v2761_v12, %v1589_v16  ;;  %v2562_v12 = vld [vmem:[%s3795_s6 + $0x10] sm:$0xff] }
 0xeba   : > { %1821 = vmatpush.bf16.msra.mxu0 %v2562_v12  ;;  %v2537_v12 = vld [vmem:[#allocation14 + $0x18] sm:$0xf0] }
 0xebb   : > { %2453 = vmatmul.msk.f32.vlgmr.msra.gmra.mxu3 %vm896_vm2, %v1590_v19  ;;  %v2727_v19 = vld [vmem:[%s3873_s16 + $0x1] ss:$0 sm:$0xff] }
 0xecd   : > { %1669 = vrot.lane.b32.xlu0 %v3612_v13, %s3880_s26  ;;  %s3885_s26 = sld [smem:[#allocation45_spill]] }
 0xecf   : > { %1747 = vrot.lane.b32.xlu1 %v3612_v13, %s3881_s1  ;;  %s2546_s1 = sshll.u32 %s3305_s4, 3 }
 0xf29   : > { %v1731_v20 = vpop.xlane.xlu1 %1730 }
 0xf2a   : > { %2768 = vrcp.f32 %v1731_v20  ;;  %v1743_v31 = vand.u32 2147483648, %v1731_v20  ;;  %vm1737_vm14 = vweird.f32 %v1731_v20  ;;  %v1741_v13 = vand.u32 2147483647, %v1731_v20 }
 0xf2c   : > { %v1653_v21 = vpop.xlane.xlu0 %1652  ;;  %v1744_v37 = vor.u32 1.1754944e-38, %v1743_v31  ;;  %vm1742_vm7 = vcmp.eq.f32.partialorder %v1741_v13, 8.507059e+37  ;;  %v2730_v13 = vld [vmem:[%s3875_s30 + $0x1] ss:$0 sm:$0xff] }
 0xf2d   : > { %2770 = vrcp.f32 %v1653_v21  ;;  %v1665_v30 = vand.u32 2147483648, %v1653_v21  ;;  %v1663_v33 = vand.u32 2147483647, %v1653_v21  ;;  %vm1659_vm3 = vweird.f32 %v1653_v21 }
 0xf2f   : > { %v1666_v36 = vor.u32 1.1754944e-38, %v1665_v30  ;;  %vm1664_vm5 = vcmp.eq.f32.partialorder %v1663_v33, 8.507059e+37 }
 0xf30   : > { %v2769_v22 = vpop.eup %2768 }
 0xf31   : > { %v1733_v23 = vmul.f32 %v2769_v22, %v1731_v20  ;;  %vm1738_vm12 = vweird.f32 %v2769_v22 }
 0xf32   : > { %vm1739_vm15 = vmor %vm1737_vm14, %vm1738_vm12 }
 0xf33   : > { %v2771_v24 = vpop.eup %2770  ;;  %v1734_v25 = vsub.f32 1.0, %v1733_v23 }
 0xf34   : > { %v1655_v26 = vmul.f32 %v2771_v24, %v1653_v21  ;;  %vm1660_vm13 = vweird.f32 %v2771_v24  ;;  %v2728_v21 = vld [vmem:[#allocation8 + $0x1] ss:$0 sm:$0xff] }
 0xf35   : > { %v1735_v27 = vmul.f32 %v2769_v22, %v1734_v25  ;;  %vm1661_vm4 = vmor %vm1659_vm3, %vm1660_vm13 }
 0xf36   : > { %v1656_v28 = vsub.f32 1.0, %v1655_v26  ;;  %v2567_v26 = vld [vmem:[%s3872_s17 + $0x28] sm:$0xff] }
 0xf37   : > { %v1736_v29 = vadd.f32 %v2769_v22, %v1735_v27  ;;  %v2566_v27 = vld [vmem:[%s3872_s17 + $0x20] sm:$0xff] }
 0xf38   : > { %v1657_v32 = vmul.f32 %v2771_v24, %v1656_v28  ;;  %v2729_v28 = vld [vmem:[%s3874_s19 + $0x1] ss:$0 sm:$0xff] }
 0xf39   : > { %v1740_v35 = vsel %vm1739_vm15, %v2769_v22, %v1736_v29 }
 0xf3a   : > { %v1658_v34 = vadd.f32 %v2771_v24, %v1657_v32  ;;  %v1745_v40 = vsel %vm1742_vm7, %v1744_v37, %v1740_v35 }
 0xf3b   : > { %v1746_v46 = vmul.f32 %v2765_v8, %v1745_v40  ;;  %v2568_v8 = vld [vmem:[%s3872_s17 + $0x30] sm:$0xff] }
 0xf3c   : > { %v1662_v38 = vsel %vm1661_vm4, %v2771_v24, %v1658_v34  ;;  %1949 = vmatpush.bf16.msrb.mxu1 %v2568_v8  ;;  %v2034_v8 = vld [vmem:[%s3885_s26] sm:$0x3] }
 0xf3d   : > { %v1667_v39 = vsel %vm1664_vm5, %v1666_v36, %v1662_v38 }
 0xf3e   : > { %v1614_v41 = vpop.f32.mrf.mxu3  ;;  %v1668_v42 = vmul.f32 %v2767_v7, %v1667_v39 }
 0xf3f   : > { %v1670_v43 = vpop.permute.xlu0 %1669  ;;  %1774 = vrot.lane.b32.xlu2 %v1614_v41, %s3882_s22 }
 0xf40   : > { %1690 = vmatpush.msra.mxu2 %v1670_v43  ;;  %1950 = vmatpush.bf16.msrb.mxu1 %v2567_v26 }
 0xf41   : > { %2456 = vmatmul.msk.f32.vlgmr.msra.gmra.mxu2 %vm896_vm2, %v1668_v42  ;;  %v1748_v45 = vpop.permute.xlu1 %1747 }
 0xf42   : > { %1768 = vmatpush.msrb.mxu3 %v1748_v45  ;;  %1894 = vmatpush.bf16.msrb.mxu2 %v2565_v18  ;;  %v2535_v45 = vld [vmem:[#allocation14 + $0x10] sm:$0xf] }
 0xf43   : > { %2459 = vmatmul.msk.f32.vlgmr.msrb.gmra.mxu3 %vm896_vm2, %v1746_v46  ;;  %v2575_v46 = vld [vmem:[#allocation14 + $0x14] sm:$0xf0] }
 0xf44   : > { %1951 = vmatpush.bf16.msrb.mxu1 %v2566_v27  ;;  %v2536_v49 = vor.u32 %v2575_v46, %v2535_v45 }
 0xf46   : > { %2066 = vmatpush.bf16.msrb.mxu0 %v2536_v49 }
 0xf99   : > { %v1775_v51 = vpop.permute.xlu2 %1774 }
 0xf9a   : > { %v1785_v52 = vsel %vm896_vm2, %v3645_v50, %v1775_v51 }
 0xfc4   : > { %v1692_v47 = vpop.f32.mrf.mxu2 }
 0xfc5   : > { %1778 = vrot.lane.b32.xlu0 %v1692_v47, %s3883_s24  ;;  %v2574_v47 = vld [vmem:[#allocation14 + $0x14] sm:$0xf] }
 0xfc6   : > { %v1770_v48 = vpop.f32.mrf.mxu3  ;;  %v2540_v51 = vor.u32 %v2574_v47, %v2537_v12 }
 0xfc7   : > { %1782 = vrot.lane.b32.xlu2 %v1770_v48, %s3884_s3  ;;  %v2571_v48 = vld [vmem:[#allocation11 + $0x8] sm:$0xff]  ;;  %s3886_s3 = sld [smem:[#allocation46_spill]] }
 0xfc8   : > { %2022 = vmatpush.bf16.msra.mxu3 %v2571_v48 }
 0xfcd   : > { %s2155_s20 = scalar_lea.hbm %s3886_s3, %s2546_s1  ;;  %s3044_s24 = scalar_lea.hbm %s3886_s3, 16 }
 0xfce   : > { %s2159_s5 = sshll.u32 %s2155_s20, 4  ;;  %s2160_s5 = int_to_ptr.hbm [resolvable:$true] %s2159_s5 }
 0xfcf   : > { %s3038_s8 = sshra.s32 %s2160_s5, 4  ;;  %s3039_s8 = int_to_ptr.hbm [resolvable:$true] %s3038_s8 }
 0xfd0   : > { %s3040_s26 = scalar_lea.hbm %s3039_s8, 8  ;;  %p3045_p7 = scmp.lt.s32.totalorder %s3039_s8, %s3886_s3 }
 0xfd1   : > { %p3041_p1 = scmp.ne.s32.totalorder %s3039_s8, %s3040_s26  ;;  %p3046_p9 = scmp.lt.s32.totalorder %s3044_s24, %s3040_s26 }
 0xfd3   : > { %p3042_p3 = pnand %p3041_p1, %p3380_p4  ;;  %p3047_p5 = por %p3046_p9, %p3045_p7 }
 0xfd5   : > { %p3043_p12 = pneg %p3042_p3 }
 0xfd7   : > { %p3048_p8 = pnand %p3047_p5, %p3043_p12 }
0x1021   : > { %v1783_v54 = vpop.permute.xlu2 %1782 }
0x1037   : > { %v1779_v53 = vpop.permute.xlu0 %1778 }
0x1038   : > { %v1786_v55 = vsel %vm835_vm0, %v1785_v52, %v1779_v53  ;;  %v2527_v52 = vld [vmem:[#allocation14] sm:$0xf]  ;;  %v2573_v53 = vld [vmem:[#allocation14 + $0x4] sm:$0xf0] }
0x1039   : > { %v1787_v56 = vsel %vm1219_vm6, %v1786_v55, %v1783_v54  ;;  %v2572_v54 = vld [vmem:[#allocation14 + $0x4] sm:$0xf]  ;;  %v2570_v55 = vld [vmem:[#allocation11] sm:$0xff] }
0x103a   : > { %v1788_v57 = vpack.c.bf16 %v1787_v56, %v1787_v56  ;;  %v2528_v56 = vor.u32 %v2573_v53, %v2527_v52  ;;  %2023 = vmatpush.bf16.msra.mxu3 %v2570_v55 }
0x103c   : > { %2473 = vmatmul.msk.bf16.vlgmr.msra.gmra.mxu0 %vm873_vm1, %v1788_v57  ;;  %v2529_v57 = vld [vmem:[#allocation14 + $0x8] sm:$0xf0] }
0x103d   : > { %2067 = vmatpush.bf16.msrb.mxu0 %v2528_v56 }
0x10b9   : > { %v1823_v59 = vpop.f32.mrf.mxu0 }
0x10ba   : > { %v1824_v60 = vadd.f32 %v2726_v58, %v1823_v59  ;;  %v2532_v58 = vor.u32 %v2572_v54, %v2529_v57 }
0x10bc   : > { %v1827_v61 = vadd.f32 %v1824_v60, %v3604_v6  ;;  %v2564_v6 = vld [vmem:[%s3799_s10 + $0x10] sm:$0xff] }
0x10bd   : > { %1895 = vmatpush.bf16.msrb.mxu2 %v2564_v6  ;;  %v2732_v6 = vld [vmem:[#allocation10 + $0x1] ss:$0 sm:$0xff] }
0x10be   : > { %v1832_v62 = vsel %vm873_vm1, %v1827_v61, 0.0 }
0x10bf   : > { %1833 = vadd.xlane.f32.xlu1 %v1832_v62 }
0x10c1   : > { %v1825_v50 = vpop.f32.mrf.mxu0  ;;  %2079 = vmatpush.bf16.msra.mxu2 %v2540_v51 }
0x10c5   : > { %2080 = vmatpush.bf16.msra.mxu2 %v2532_v58 }
0x1132   : > { %v1834_v63 = vpop.xlane.xlu1 %1833 }
0x1133   : > { %v1835_v0 = vmul.f32 %v1834_v63, %v3557_v9 }
0x1135   : > { %v1836_v1 = vsub.f32 %v1827_v61, %v1835_v0 }
0x1137   : > { %v1837_v44 = vmul.f32 %v1836_v1, %v1836_v1 }
0x1139   : > { %v1838_v2 = vsel %vm873_vm1, %v1837_v44, 0.0 }
0x113a   : > { %1839 = vadd.xlane.f32.xlu0 %v1838_v2  ;;  %v2731_v2 = vld [vmem:[%s3876_s13 + $0x1] ss:$0 sm:$0xff] }
0x11ad   : > { %v1840_v4 = vpop.xlane.xlu0 %1839 }
0x11ae   : > { %v1841_v5 = vmul.f32 %v1840_v4, %v3557_v9 }
0x11b0   : > { %v1842_v10 = vadd.f32 1e-05, %v1841_v5 }
0x11b2   : > { %2772 = vrsqrt.f32 %v1842_v10  ;;  %vm1849_vm2 = vweird.f32 %v1842_v10 }
0x11b8   : > { %v2773_v11 = vpop.eup %2772 }
0x11b9   : > { %v1844_v14 = vmul.f32 %v2773_v11, %v1842_v10  ;;  %vm1850_vm0 = vweird.f32 %v2773_v11  ;;  %v2056_v10 = vperm.slane %v2034_v8, 0 }
0x11ba   : > { %vm1851_vm6 = vmor %vm1849_vm2, %vm1850_vm0 }
0x11bb   : > { %v1845_v7 = vmul.f32 %v2773_v11, %v1844_v14 }
0x11bd   : > { %v1846_v15 = vmul.f32 0.5, %v1845_v7 }
0x11bf   : > { %v1847_v16 = vsub.f32 1.5, %v1846_v15  ;;  %v2733_v15 = vld [vmem:[#allocation13] ss:$0 sm:$0xff] }
0x11c1   : > { %v1848_v17 = vmul.f32 %v2773_v11, %v1847_v16  ;;  %v2057_v16 = vperm.slane %v2034_v8, 1 }
0x11c3   : > { %v1852_v20 = vsel %vm1851_vm6, %v2773_v11, %v1848_v17 }
0x11c4   : > { %v1853_v22 = vmul.f32 %v1852_v20, %v1836_v1 }
0x11c6   : > { %v1857_v23 = vmul.f32 %v2727_v19, %v1853_v22 }
0x11c8   : > { %v1861_v24 = vadd.f32 %v2728_v21, %v1857_v23 }
0x11ca   : > { %v1862_v25 = vpack.c.bf16 %v1861_v24, %v1861_v24 }
0x11cc   : > { %2488 = vmatmul.msk.bf16.vlgmr.msrb.gmra.mxu2 %vm873_vm1, %v1862_v25 }
0x124f   : > { %v1897_v29 = vpop.f32.mrf.mxu2 }
0x1250   : > { %v1898_v30 = vadd.f32 %v2729_v28, %v1897_v29 }
0x1252   : > { %v1901_v31 = vmax.f32 %v1898_v30, 0.0 }
0x1254   : > { %v1902_v32 = vpack.c.bf16 %v1901_v31, %v1901_v31 }
0x1256   : > { %2514 = vmatmul.msk.bf16.vlgmr.msrb.gmra.mxu1 %vm1373_vm11, %v1902_v32 }
0x1257   : > { %v1899_v33 = vpop.f32.mrf.mxu2 }
0x12d3   : > { %v1953_v34 = vpop.f32.mrf.mxu1 }
0x12d4   : > { %v1954_v35 = vadd.f32 %v2730_v13, %v1953_v34 }
0x12d6   : > { %v1957_v36 = vadd.f32 %v1954_v35, %v1861_v24 }
0x12d8   : > { %v1962_v37 = vsel %vm873_vm1, %v1957_v36, 0.0 }
0x12d9   : > { %1963 = vadd.xlane.f32.xlu2 %v1962_v37 }
0x12db   : > { %v1955_v38 = vpop.f32.mrf.mxu1 }
0x134c   : > { %v1964_v39 = vpop.xlane.xlu2 %1963 }
0x134d   : > { %v1965_v40 = vmul.f32 %v1964_v39, %v3557_v9 }
0x134f   : > { %v1966_v41 = vsub.f32 %v1957_v36, %v1965_v40 }
0x1351   : > { %v1967_v42 = vmul.f32 %v1966_v41, %v1966_v41 }
0x1353   : > { %v1968_v43 = vsel %vm873_vm1, %v1967_v42, 0.0 }
0x1354   : > { %1969 = vadd.xlane.f32.xlu1 %v1968_v43 }
0x13c7   : > { %v1970_v59 = vpop.xlane.xlu1 %1969 }
0x13c8   : > { %v1971_v60 = vmul.f32 %v1970_v59, %v3557_v9 }
0x13ca   : > { %v1972_v61 = vadd.f32 1e-05, %v1971_v60 }
0x13cc   : > { %2774 = vrsqrt.f32 %v1972_v61  ;;  %vm1979_vm8 = vweird.f32 %v1972_v61 }
0x13d2   : > { %v2775_v62 = vpop.eup %2774 }
0x13d3   : > { %v1974_v50 = vmul.f32 %v2775_v62, %v1972_v61  ;;  %vm1980_vm11 = vweird.f32 %v2775_v62 }
0x13d4   : > { %vm1981_vm9 = vmor %vm1979_vm8, %vm1980_vm11 }
0x13d5   : > { %v1975_v63 = vmul.f32 %v2775_v62, %v1974_v50 }
0x13d7   : > { %v1976_v0 = vmul.f32 0.5, %v1975_v63 }
0x13d9   : > { %v1977_v1 = vsub.f32 1.5, %v1976_v0 }
0x13db   : > { %v1978_v44 = vmul.f32 %v2775_v62, %v1977_v1 }
0x13dd   : > { %v1982_v18 = vsel %vm1981_vm9, %v2775_v62, %v1978_v44 }
0x13de   : > { %v1983_v3 = vmul.f32 %v1982_v18, %v1966_v41 }
0x13e0   : > { %v1987_v9 = vmul.f32 %v2731_v2, %v1983_v3 }
0x13e2   : > { %v3721_v4 = vadd.f32 %v2732_v6, %v1987_v9 }
0x13e4   : > { %v1992_v5 = vpack.c.bf16 %v3721_v4, %v3721_v4 }
0x13e6   : > { %2524 = vmatmul.msk.bf16.vlgmr.msra.gmra.mxu3 %vm873_vm1, %v1992_v5  ;;  %2541 = vmatmul.msk.bf16.vlgmr.msrb.gmra.mxu0 %vm873_vm1, %v1992_v5 }
0x13e7   : > { %2542 = vmatmul.msk.bf16.vlgmr.msra.gmra.mxu2 %vm873_vm1, %v1992_v5 }
0x1463   : > { %v2069_v11 = vpop.f32.mrf.mxu0 }
0x1464   : > { %v2070_v14 = vadd.f32 %v2069_v11, %v2056_v10 }
0x1466   : > { %v2543_v7 = vmul.f32 -1.442695, %v2070_v14 }
0x1468   : > { %2776 = vpow2.f32 %v2543_v7 }
0x1469   : > { %v2025_v17 = vpop.f32.mrf.mxu3 }
0x146a   : > { %v2026_v19 = vadd.f32 %v2733_v15, %v2025_v17  ;;  %v2082_v20 = vpop.f32.mrf.mxu2 }
0x146b   : > { %v2083_v21 = vadd.f32 %v2082_v20, %v2057_v16  ;;  %v2071_v22 = vpop.f32.mrf.mxu0 }
0x146c   : > { %2029 = vst [vmem:[%s809_s29] sm:$0xff] %v2026_v19 }
0x146d   : > { %v2544_v23 = vmul.f32 -1.442695, %v2083_v21 }
0x146e   : > { %3051 = shalt.err (!%p3048_p8)
}
0x146f   : > { %2606 = dma.vmem_to_hbm [thread:$0]  (%p3380_p4), %s2158_s28, 128, %s2160_s5, %s2140_s21   ;;  %v2777_v24 = vpop.eup %2776  ;;  %2778 = vpow2.f32 %v2544_v23  ;;  %v2134_v46 = vlaneseq  ;;  %vm2129_vm4 = vcmask 1040384   ;;  %vm2131_vm7 = vcmask 1041408  }
0x1470   : > { %v2092_v25 = vadd.f32 1.0, %v2777_v24  ;;  %s2576_s29 = smul.u32 3, %s3433_s0  ;;  %s3890_s8 = sld [smem:[#allocation47_spill]]  ;;  %v2128_v53 = vrot.slane %v3721_v4, 6 }
0x1471   : > { %v2027_v26 = vpop.f32.mrf.mxu3  ;;  %s2577_s5 = smul.u32 3, %s3305_s4  ;;  %vm2136_vm0 = vcmp.lt.s32.totalorder %v2134_v46, 288  ;;  %s2145_s24 = scalar_lea.sflag [#allocation18], %s3433_s0 }
0x1472   : > { %2780 = vrcp.f32 %v2092_v25  ;;  %v2084_v27 = vpop.f32.mrf.mxu2  ;;  %vm2099_vm12 = vweird.f32 %v2092_v25  ;;  %v2105_v40 = vand.u32 2147483648, %v2092_v25  ;;  %v2103_v42 = vand.u32 2147483647, %v2092_v25  ;;  %s816_s4 = scalar_lea.vmem [#allocation17], %s2576_s29 }
0x1473   : > { %s2171_s1 = sshll.u32 %s816_s4, 4  ;;  %s2172_s1 = int_to_ptr.vmem [resolvable:$true] %s2171_s1 }
0x1474   : > { %v2106_v49 = vor.u32 1.1754944e-38, %v2105_v40  ;;  %vm2104_vm5 = vcmp.eq.f32.partialorder %v2103_v42, 8.507059e+37 }
0x1475   : > { %v2779_v28 = vpop.eup %2778 }
0x1476   : > { %v2093_v29 = vadd.f32 1.0, %v2779_v28  ;;  %s2169_s26 = scalar_lea.hbm %s3890_s8, %s2577_s5  ;;  %s3072_s28 = scalar_lea.hbm %s3890_s8, 6 }
0x1477   : > { %s2173_s22 = sshll.u32 %s2169_s26, 4  ;;  %s2174_s22 = int_to_ptr.hbm [resolvable:$true] %s2173_s22 }
0x1478   : > { %v2781_v30 = vpop.eup %2780  ;;  %2782 = vrcp.f32 %v2093_v29  ;;  %v2120_v36 = vand.u32 2147483648, %v2093_v29  ;;  %v2118_v39 = vand.u32 2147483647, %v2093_v29  ;;  %vm2114_vm14 = vweird.f32 %v2093_v29  ;;  %s3066_s20 = sshra.s32 %s2174_s22, 4  ;;  %s3067_s20 = int_to_ptr.hbm [resolvable:$true] %s3066_s20 }
0x1479   : > { %v2095_v31 = vmul.f32 %v2781_v30, %v2092_v25  ;;  %vm2100_vm1 = vweird.f32 %v2781_v30  ;;  %s3068_s15 = scalar_lea.hbm %s3067_s20, 3  ;;  %p3073_p0 = scmp.lt.s32.totalorder %s3067_s20, %s3890_s8 }
0x147a   : > { %vm3750_vm13 = vmor %vm2099_vm12, %vm2100_vm1  ;;  %v2121_v45 = vor.u32 1.1754944e-38, %v2120_v36  ;;  %vm2119_vm3 = vcmp.eq.f32.partialorder %v2118_v39, 8.507059e+37  ;;  %p3069_p10 = scmp.ne.s32.totalorder %s3067_s20, %s3068_s15  ;;  %p3074_p2 = scmp.lt.s32.totalorder %s3072_s28, %s3068_s15 }
0x147b   : > { %v2096_v32 = vsub.f32 1.0, %v2095_v31 }
0x147c   : > { %p3070_p13 = pnand %p3069_p10, %p3380_p4  ;;  %p3075_p1 = por %p3074_p2, %p3073_p0 }
0x147d   : > { %v2097_v13 = vmul.f32 %v2781_v30, %v2096_v32 }
0x147e   : > { %v2783_v33 = vpop.eup %2782  ;;  %p3071_p11 = pneg %p3070_p13 }
0x147f   : > { %v2110_v34 = vmul.f32 %v2783_v33, %v2093_v29  ;;  %v2098_v37 = vadd.f32 %v2781_v30, %v2097_v13  ;;  %vm2115_vm10 = vweird.f32 %v2783_v33 }
0x1480   : > { %vm2116_vm15 = vmor %vm2114_vm14, %vm2115_vm10  ;;  %p3076_p3 = pnand %p3075_p1, %p3071_p11 }
0x1481   : > { %v2111_v35 = vsub.f32 1.0, %v2110_v34  ;;  %v2102_v47 = vsel %vm3750_vm13, %v2781_v30, %v2098_v37 }
0x1482   : > { %v2107_v52 = vsel %vm2104_vm5, %v2106_v49, %v2102_v47 }
0x1483   : > { %v2112_v38 = vmul.f32 %v2783_v33, %v2111_v35 }
0x1485   : > { %v2113_v43 = vadd.f32 %v2783_v33, %v2112_v38 }
0x1487   : > { %v2117_v48 = vsel %vm2116_vm15, %v2783_v33, %v2113_v43 }
0x1488   : > { %v2122_v12 = vsel %vm2119_vm3, %v2121_v45, %v2117_v48 }
0x1489   : > { %v2127_v51 = vrot.slane %v2122_v12, 7 }
0x148b   : > { %v2130_v54 = vsel %vm2129_vm4, %v2107_v52, %v2127_v51 }
0x148c   : > { %v2132_v55 = vsel %vm2131_vm7, %v2130_v54, %v2128_v53 }
0x148d   : > { %2138 = vst.msk [vmem:[%s816_s4] sm:$0x7] %vm2136_vm0, %v2132_v55 }
0x148e   : > { %3079 = shalt.err (!%p3076_p3)
}
0x148f   : > { %2607 = dma.vmem_to_hbm [thread:$0]  (%p3380_p4), %s2172_s1, 48, %s2174_s22, %s2145_s24  }
0x1490 PF: > { %s2185_s0 = sand.u32 1, %s3130_s2   ;;  %p3891_p12 = scmp.ge.s32.totalorder %s3142_s27, 2 }
0x1491   : > { %s2186_s4 = scalar_lea.sflag [#allocation4], %s2185_s0 }
0x1492   : > { %p2637_p7 = pnand %p3891_p12, %p3384_p6 }
0x1494   : > { %p2638_p9 = pneg %p2637_p7 }
0x1496   : > { %3121 = dma.done.wait (%p2638_p9), %s2186_s4, 128  }
0x1497   : > { %3123 = vsyncadd (%p2638_p9), %s2186_s4, 4294967168  ;;  %s2196_s20 = scalar_lea.sflag [#allocation18], %s2185_s0 }
0x1498   : > { %3125 = dma.done.wait (%p2638_p9), %s2196_s20, 48  }
0x1499   : > { %3127 = vsyncadd (%p2638_p9), %s2196_s20, 4294967248  ;;  %s3892_s15 = sld [smem:[#allocation27_spill]]  ;;  %p44_p4 = scmp.ge.s32.totalorder %s3352_s23, 4  }
0x149a   : > { %s3893_s26 = sld [smem:[#allocation28_spill]]  ;;  %s3894_s2 = smov %s3134_s25 }
0x149b   : > { %s3896_s27 = smov %s3352_s23  ;;  %46 = sbr.rel (!%p44_p4) target bundleno = 32 (0x20), region = 211 }
0x149f   : > { %s3895_s25 = smov %s3892_s15 }
0x14a0   :  { %2202 = vsyncpa [#allocation3], 1 }
0x14a1   :  { %2204 = vsyncpa [#allocation3 + $0x1], 1 }
0x14a2   :  { %2205 = vsyncpa [#allocation6], 1 }
0x14a3   :  { %2207 = vsyncpa [#allocation6 + $0x1], 1 }
0x14a4   :  { %2208 = vsyncpa [#allocation9], 1 }
0x14a5   :  { %2209 = vsyncpa [#allocation12], 1 }
0x14a6   :  { %2210 = vsyncpa [#allocation15], 1 }
0x14a7   :  { %2211 = vsyncpa [#allocation4], 1 }
0x14a8   :  { %2213 = vsyncpa [#allocation4 + $0x1], 1 }
0x14a9   :  { %2214 = vsyncpa [#allocation18], 1 }
0x14aa   :  { %2216 = vsyncpa [#allocation18 + $0x1], 1 }

</bundles_post_ra>
